<compile_context>
chip_gen: v6e
topology: v6e:2x2x1
jax: 0.10.0
libtpu: 0.0.40
codegen_flags: <defaults>
</compile_context>

<pallas_src>
import functools

import jax
import jax.numpy as jnp
from jax.experimental import pallas as pl
from jax.experimental.pallas import tpu as pltpu


# ----------------------------- helpers --------------------------------
def _choose_tq(lt, max_tq=256):
    """Pick a query-tile size: full length if small, else a multiple of 8 that divides Lt."""
    if lt <= max_tq:
        return lt
    for tq in range(max_tq, 7, -8):
        if lt % tq == 0:
            return tq
    return lt


def _layer_norm(x, g, b, eps):
    mu = jnp.mean(x, axis=-1, keepdims=True)
    xc = x - mu
    var = jnp.mean(xc * xc, axis=-1, keepdims=True)
    return xc * jax.lax.rsqrt(var + eps) * g[None, :] + b[None, :]


# ------------------------- DecoderLayer kernel -------------------------
def decoder_layer_kernel(
    trg_q_ref, trg_kv_ref, enc_ref, tbias_ref, sbias_ref,
    w_self_ref, b_self_ref, w_enc_ref, b_enc_ref,
    ln_g_ref, ln_b_ref, w1_ref, b1_ref, w2_ref, b2_ref,
    out_ref, attn_ref,
    q_scr, k_scr, v_scr, ctx_scr,
    *, n_heads, head_dim, eps,
):
    xq0 = trg_q_ref[0]      # [TQ, D]  query rows of this grid step
    xkv = trg_kv_ref[0]     # [Lt, D]  full target sequence (self-attn K/V)
    enc = enc_ref[0]        # [Ls, D]
    tbias = tbias_ref[0]    # [TQ, Lt] additive mask bias (0 or -1e10)
    sbias = sbias_ref[0]    # [TQ, Ls]

    hd = head_dim
    scale = jnp.sqrt(jnp.float32(hd))

    def mha(xq, xkv_, W, Bv, bias, attn_sink=None):
        # W: [4, D, D] (q, k, v, o);  Bv: [4, D]
        lk = xkv_.shape[0]
        q = jnp.dot(xq, W[0], preferred_element_type=jnp.float32) + Bv[0][None, :]
        k = jnp.dot(xkv_, W[1], preferred_element_type=jnp.float32) + Bv[1][None, :]
        v = jnp.dot(xkv_, W[2], preferred_element_type=jnp.float32) + Bv[2][None, :]

        # Scatter per-head slices into head-major VMEM scratch slabs
        # (replaces jnp.stack / jnp.concatenate relayouts).
        for h in range(n_heads):
            sl = slice(h * hd, (h + 1) * hd)
            q_scr[h] = q[:, sl]
            k_scr[h, 0:lk, :] = k[:, sl]
            v_scr[h, 0:lk, :] = v[:, sl]

        qh = q_scr[...]             # [H, TQ, hd]
        kh = k_scr[:, 0:lk, :]      # [H, Lk, hd]
        vh = v_scr[:, 0:lk, :]      # [H, Lk, hd]

        # Single batched MXU contraction over all heads.
        s = jnp.einsum("hqd,hkd->hqk", qh, kh,
                       preferred_element_type=jnp.float32) / scale
        s = s + bias[None, :, :]    # additive mask bias == masked_fill here

        m = jnp.max(s, axis=-1, keepdims=True)
        p = jnp.exp(s - m)
        denom = jnp.sum(p, axis=-1, keepdims=True)
        a = p * pl.reciprocal(denom, approx=False)   # approx=True -> EUP, looser tol

        ctx = jnp.einsum("hqk,hkd->hqd", a, vh,
                         preferred_element_type=jnp.float32)   # [H, TQ, hd]
        for h in range(n_heads):
            ctx_scr[:, h * hd:(h + 1) * hd] = ctx[h]

        out = (jnp.dot(ctx_scr[...], W[3], preferred_element_type=jnp.float32)
               + Bv[3][None, :])
        if attn_sink is not None:
            attn_sink[0] = a.astype(attn_sink.dtype)
        return out

    w_self = w_self_ref[...]
    b_self = b_self_ref[...]
    w_enc = w_enc_ref[...]
    b_enc = b_enc_ref[...]
    ln_g = ln_g_ref[...]
    ln_b = ln_b_ref[...]

    # --- self attention + residual + LN (dropout = identity, eval mode) ---
    sa = mha(xq0, xkv, w_self, b_self, tbias)
    t1 = _layer_norm(xq0 + sa, ln_g[0], ln_b[0], eps)

    # --- encoder (cross) attention + residual + LN; emit attention probs ---
    ea = mha(t1, enc, w_enc, b_enc, sbias, attn_sink=attn_ref)
    t2 = _layer_norm(t1 + ea, ln_g[1], ln_b[1], eps)

    # --- position-wise feed-forward + residual + LN ---
    h1 = jnp.maximum(
        jnp.dot(t2, w1_ref[...], preferred_element_type=jnp.float32) + b1_ref[...],
        0.0)
    ff = jnp.dot(h1, w2_ref[...], preferred_element_type=jnp.float32) + b2_ref[...]
    t3 = _layer_norm(t2 + ff, ln_g[2], ln_b[2], eps)

    out_ref[0] = t3.astype(out_ref.dtype)


def decoder_layer_pallas(trg, enc_src, tbias, sbias, p, *, n_heads, eps=1e-5):
    B, Lt, D = trg.shape
    Ls = enc_src.shape[1]
    P = p["w1"].shape[1]
    H = n_heads
    hd = D // H
    TQ = _choose_tq(Lt)
    nq = Lt // TQ
    Lkv = max(Lt, Ls)

    kernel = functools.partial(decoder_layer_kernel,
                               n_heads=H, head_dim=hd, eps=eps)

    in_specs = [
        pl.BlockSpec((1, TQ, D), lambda b, q: (b, q, 0)),    # trg query tile
        pl.BlockSpec((1, Lt, D), lambda b, q: (b, 0, 0)),    # trg full (self K/V)
        pl.BlockSpec((1, Ls, D), lambda b, q: (b, 0, 0)),    # enc_src
        pl.BlockSpec((1, TQ, Lt), lambda b, q: (b, q, 0)),   # trg mask bias
        pl.BlockSpec((1, TQ, Ls), lambda b, q: (b, q, 0)),   # src mask bias
        pl.BlockSpec((4, D, D), lambda b, q: (0, 0, 0)),     # w_self (q,k,v,o)
        pl.BlockSpec((4, D), lambda b, q: (0, 0)),           # b_self
        pl.BlockSpec((4, D, D), lambda b, q: (0, 0, 0)),     # w_enc
        pl.BlockSpec((4, D), lambda b, q: (0, 0)),           # b_enc
        pl.BlockSpec((3, D), lambda b, q: (0, 0)),           # ln gamma (self, enc, ff)
        pl.BlockSpec((3, D), lambda b, q: (0, 0)),           # ln beta
        pl.BlockSpec((D, P), lambda b, q: (0, 0)),           # ff w1
        pl.BlockSpec((1, P), lambda b, q: (0, 0)),           # ff b1
        pl.BlockSpec((P, D), lambda b, q: (0, 0)),           # ff w2
        pl.BlockSpec((1, D), lambda b, q: (0, 0)),           # ff b2
    ]
    out_specs = (
        pl.BlockSpec((1, TQ, D), lambda b, q: (b, q, 0)),
        pl.BlockSpec((1, H, TQ, Ls), lambda b, q: (b, 0, q, 0)),
    )
    scratch_shapes = [
        pltpu.VMEM((H, TQ, hd), jnp.float32),    # head-major Q
        pltpu.VMEM((H, Lkv, hd), jnp.float32),   # head-major K (shared self/cross)
        pltpu.VMEM((H, Lkv, hd), jnp.float32),   # head-major V
        pltpu.VMEM((TQ, D), jnp.float32),        # concatenated context
    ]

    return pl.pallas_call(
        kernel,
        grid=(B, nq),
        in_specs=in_specs,
        out_specs=out_specs,
        out_shape=(
            jax.ShapeDtypeStruct((B, Lt, D), jnp.float32),
            jax.ShapeDtypeStruct((B, H, Lt, Ls), jnp.float32),
        ),
        scratch_shapes=scratch_shapes,
        compiler_params=pltpu.CompilerParams(
            dimension_semantics=("parallel", "parallel"),
            vmem_limit_bytes=64 * 1024 * 1024,
        ),
    )(trg, trg, enc_src, tbias, sbias,
      p["w_self"], p["b_self"], p["w_enc"], p["b_enc"],
      p["ln_g"], p["ln_b"], p["w1"], p["b1"], p["w2"], p["b2"])


# --------------------------- fc_out kernel -----------------------------
def _linear_kernel(x_ref, w_ref, b_ref, o_ref):
    o_ref[...] = (jnp.dot(x_ref[...], w_ref[...],
                          preferred_element_type=jnp.float32)
                  + b_ref[...]).astype(o_ref.dtype)


def linear_pallas(x2, w, b):
    R, _ = x2.shape
    V = w.shape[1]
    return pl.pallas_call(
        _linear_kernel,
        out_shape=jax.ShapeDtypeStruct((R, V), jnp.float32),
    )(x2, w, b)


# ----------------------------- Decoder ---------------------------------
def decoder_pallas(trg_tokens, enc_src, trg_mask, src_mask, params, *, n_heads, eps=1e-5):
    B, Lt = trg_tokens.shape
    D = params["tok_emb"].shape[1]
    # TODO(synk): token/positional embedding gather stays in XLA (jnp.take); a
    # Pallas scalar-prefetch gather kernel is possible but not worthwhile here.
    x = (jnp.take(params["tok_emb"], trg_tokens, axis=0) * jnp.sqrt(jnp.float32(D))
         + params["pos_emb"][:Lt][None, :, :])
    # Convert int masks ONCE into f32 additive biases (hoists mask==0 compare
    # out of the kernels; -1e10 add == masked_fill at these magnitudes).
    tbias = jnp.where(trg_mask == 0, -1e10, 0.0).astype(jnp.float32)
    sbias = jnp.where(src_mask == 0, -1e10, 0.0).astype(jnp.float32)

    attn = None
    for lp in params["layers"]:
        x, attn = decoder_layer_pallas(x, enc_src, tbias, sbias, lp,
                                       n_heads=n_heads, eps=eps)

    x2 = x.reshape(B * Lt, D)
    logits = linear_pallas(x2, params["w_out"], params["b_out"]).reshape(B, Lt, -1)
    return logits, attn


# ------------------------- pure-JAX reference ---------------------------
def _ref_mha(xq, xkv, W, Bv, mask, n_heads):
    Bsz, Lq, D = xq.shape
    Lk = xkv.shape[1]
    hd = D // n_heads
    q = xq @ W[0] + Bv[0]
    k = xkv @ W[1] + Bv[1]
    v = xkv @ W[2] + Bv[2]
    qh = q.reshape(Bsz, Lq, n_heads, hd).transpose(0, 2, 1, 3)
    kh = k.reshape(Bsz, Lk, n_heads, hd).transpose(0, 2, 1, 3)
    vh = v.reshape(Bsz, Lk, n_heads, hd).transpose(0, 2, 1, 3)
    e = jnp.einsum("bhqd,bhkd->bhqk", qh, kh) / jnp.sqrt(jnp.float32(hd))
    e = jnp.where(mask[:, None, :, :] == 0, -1e10, e)
    a = jax.nn.softmax(e, axis=-1)
    ctx = jnp.einsum("bhqk,bhkd->bhqd", a, vh)
    ctx = ctx.transpose(0, 2, 1, 3).reshape(Bsz, Lq, D)
    return ctx @ W[3] + Bv[3], a


def _ref_ln(x, g, b, eps=1e-5):
    mu = jnp.mean(x, axis=-1, keepdims=True)
    var = jnp.mean((x - mu) ** 2, axis=-1, keepdims=True)
    return (x - mu) / jnp.sqrt(var + eps) * g + b


def decoder_layer_ref(trg, enc_src, trg_mask, src_mask, p, *, n_heads, eps=1e-5):
    sa, _ = _ref_mha(trg, trg, p["w_self"], p["b_self"], trg_mask, n_heads)
    trg = _ref_ln(trg + sa, p["ln_g"][0], p["ln_b"][0], eps)
    ea, attn = _ref_mha(trg, enc_src, p["w_enc"], p["b_enc"], src_mask, n_heads)
    trg = _ref_ln(trg + ea, p["ln_g"][1], p["ln_b"][1], eps)
    h = jax.nn.relu(trg @ p["w1"] + p["b1"][0])
    ff = h @ p["w2"] + p["b2"][0]
    trg = _ref_ln(trg + ff, p["ln_g"][2], p["ln_b"][2], eps)
    return trg, attn


def decoder_ref(trg_tokens, enc_src, trg_mask, src_mask, params, *, n_heads):
    D = params["tok_emb"].shape[1]
    Lt = trg_tokens.shape[1]
    x = (params["tok_emb"][trg_tokens] * jnp.sqrt(jnp.float32(D))
         + params["pos_emb"][:Lt][None])
    attn = None
    for lp in params["layers"]:
        x, attn = decoder_layer_ref(x, enc_src, trg_mask, src_mask, lp, n_heads=n_heads)
    out = x @ params["w_out"] + params["b_out"][0]
    return out, attn


# ------------------------------- main -----------------------------------
if __name__ == "__main__":
    B, Lt, Ls, D, H, P = 2, 8, 16, 32, 4, 64
    V, n_layers, max_len = 40, 2, 100

    key = jax.random.PRNGKey(0)
    k_iter = iter(jax.random.split(key, 64))

    def nrm(shape, s=0.1):
        return s * jax.random.normal(next(k_iter), shape, jnp.float32)

    layers = []
    for _ in range(n_layers):
        layers.append({
            "w_self": nrm((4, D, D)), "b_self": nrm((4, D)),
            "w_enc": nrm((4, D, D)), "b_enc": nrm((4, D)),
            "ln_g": 1.0 + nrm((3, D), 0.05), "ln_b": nrm((3, D), 0.05),
            "w1": nrm((D, P)), "b1": nrm((1, P)),
            "w2": nrm((P, D)), "b2": nrm((1, D)),
        })
    params = {
        "tok_emb": nrm((V, D)),
        "pos_emb": nrm((max_len, D)),
        "w_out": nrm((D, V)),
        "b_out": nrm((1, V)),
        "layers": layers,
    }

    trg_tokens = jax.random.randint(next(k_iter), (B, Lt), 0, V)
    enc_src = jax.random.normal(next(k_iter), (B, Ls, D), jnp.float32)

    # causal self-attention mask; cross mask with padded source positions in batch 1
    trg_mask = jnp.broadcast_to(
        jnp.tril(jnp.ones((Lt, Lt), jnp.int32))[None, :, :], (B, Lt, Lt))
    src_len = jnp.array([Ls, Ls - 3])
    src_mask = jnp.broadcast_to(
        (jnp.arange(Ls)[None, None, :] < src_len[:, None, None]).astype(jnp.int32),
        (B, Lt, Ls))

    out, attn = decoder_pallas(trg_tokens, enc_src, trg_mask, src_mask,
                               params, n_heads=H)
    out = jax.block_until_ready(out)
    attn = jax.block_until_ready(attn)

    ref_out, ref_attn = decoder_ref(trg_tokens, enc_src, trg_mask, src_mask,
                                    params, n_heads=H)

    assert out.shape == (B, Lt, V) and attn.shape == (B, H, Lt, Ls)
    assert jnp.allclose(out, ref_out, atol=5e-4, rtol=5e-4), \
        float(jnp.max(jnp.abs(out - ref_out)))
    assert jnp.allclose(attn, ref_attn, atol=5e-4, rtol=5e-4), \
        float(jnp.max(jnp.abs(attn - ref_attn)))

    print("KERNEL_OK")
</pallas_src>

<mosaic_0001>
module attributes {stable_mosaic.version = 11 : i64} {
  func.func @decoder_layer_kernel(%arg0: i32, %arg1: i32, %arg2: memref<1x8x32xf32, #tpu.memory_space<vmem>>, %arg3: memref<1x8x32xf32, #tpu.memory_space<vmem>>, %arg4: memref<1x16x32xf32, #tpu.memory_space<vmem>>, %arg5: memref<1x8x8xf32, #tpu.memory_space<vmem>>, %arg6: memref<1x8x16xf32, #tpu.memory_space<vmem>>, %arg7: memref<4x32x32xf32, #tpu.memory_space<vmem>>, %arg8: memref<4x32xf32, #tpu.memory_space<vmem>>, %arg9: memref<4x32x32xf32, #tpu.memory_space<vmem>>, %arg10: memref<4x32xf32, #tpu.memory_space<vmem>>, %arg11: memref<3x32xf32, #tpu.memory_space<vmem>>, %arg12: memref<3x32xf32, #tpu.memory_space<vmem>>, %arg13: memref<32x64xf32, #tpu.memory_space<vmem>>, %arg14: memref<1x64xf32, #tpu.memory_space<vmem>>, %arg15: memref<64x32xf32, #tpu.memory_space<vmem>>, %arg16: memref<1x32xf32, #tpu.memory_space<vmem>>, %arg17: memref<1x8x32xf32, #tpu.memory_space<vmem>>, %arg18: memref<1x4x8x16xf32, #tpu.memory_space<vmem>>, %arg19: memref<4x8x8xf32, #tpu.memory_space<vmem>>, %arg20: memref<4x16x8xf32, #tpu.memory_space<vmem>>, %arg21: memref<4x16x8xf32, #tpu.memory_space<vmem>>, %arg22: memref<8x32xf32, #tpu.memory_space<vmem>>) attributes {dimension_semantics = [#tpu.dimension_semantics<parallel>, #tpu.dimension_semantics<parallel>], iteration_bounds = array<i64: 2, 1>, scalar_prefetch = 0 : i64, scratch_operands = 4 : i64, tpu.core_type = #tpu.core_type<tc>, window_params = [{transform_indices = @transform_0, window_bounds = array<i64: 1, 8, 32>}, {transform_indices = @transform_1, window_bounds = array<i64: 1, 8, 32>}, {transform_indices = @transform_2, window_bounds = array<i64: 1, 16, 32>}, {transform_indices = @transform_3, window_bounds = array<i64: 1, 8, 8>}, {transform_indices = @transform_4, window_bounds = array<i64: 1, 8, 16>}, {pipeline_mode = #tpu.pipeline_mode<synchronous>, transform_indices = @transform_5, window_bounds = array<i64: 4, 32, 32>}, {pipeline_mode = #tpu.pipeline_mode<synchronous>, transform_indices = @transform_6, window_bounds = array<i64: 4, 32>}, {pipeline_mode = #tpu.pipeline_mode<synchronous>, transform_indices = @transform_7, window_bounds = array<i64: 4, 32, 32>}, {pipeline_mode = #tpu.pipeline_mode<synchronous>, transform_indices = @transform_8, window_bounds = array<i64: 4, 32>}, {pipeline_mode = #tpu.pipeline_mode<synchronous>, transform_indices = @transform_9, window_bounds = array<i64: 3, 32>}, {pipeline_mode = #tpu.pipeline_mode<synchronous>, transform_indices = @transform_10, window_bounds = array<i64: 3, 32>}, {pipeline_mode = #tpu.pipeline_mode<synchronous>, transform_indices = @transform_11, window_bounds = array<i64: 32, 64>}, {pipeline_mode = #tpu.pipeline_mode<synchronous>, transform_indices = @transform_12, window_bounds = array<i64: 1, 64>}, {pipeline_mode = #tpu.pipeline_mode<synchronous>, transform_indices = @transform_13, window_bounds = array<i64: 64, 32>}, {pipeline_mode = #tpu.pipeline_mode<synchronous>, transform_indices = @transform_14, window_bounds = array<i64: 1, 32>}, {transform_indices = @transform_15, window_bounds = array<i64: 1, 8, 32>}, {transform_indices = @transform_16, window_bounds = array<i64: 1, 4, 8, 16>}]} {
    %c0 = arith.constant 0 : index
    %c0_0 = arith.constant 0 : index
    %c0_1 = arith.constant 0 : index
    %0 = vector.load %arg2[%c0, %c0_0, %c0_1] : memref<1x8x32xf32, #tpu.memory_space<vmem>>, vector<1x8x32xf32>
    %1 = vector.shape_cast %0 : vector<1x8x32xf32> to vector<8x32xf32>
    %c0_2 = arith.constant 0 : index
    %c0_3 = arith.constant 0 : index
    %c0_4 = arith.constant 0 : index
    %2 = vector.load %arg3[%c0_2, %c0_3, %c0_4] : memref<1x8x32xf32, #tpu.memory_space<vmem>>, vector<1x8x32xf32>
    %3 = vector.shape_cast %2 : vector<1x8x32xf32> to vector<8x32xf32>
    %c0_5 = arith.constant 0 : index
    %c0_6 = arith.constant 0 : index
    %c0_7 = arith.constant 0 : index
    %4 = vector.load %arg4[%c0_5, %c0_6, %c0_7] : memref<1x16x32xf32, #tpu.memory_space<vmem>>, vector<1x16x32xf32>
    %5 = vector.shape_cast %4 : vector<1x16x32xf32> to vector<16x32xf32>
    %c0_8 = arith.constant 0 : index
    %c0_9 = arith.constant 0 : index
    %c0_10 = arith.constant 0 : index
    %6 = vector.load %arg5[%c0_8, %c0_9, %c0_10] : memref<1x8x8xf32, #tpu.memory_space<vmem>>, vector<1x8x8xf32>
    %7 = vector.shape_cast %6 : vector<1x8x8xf32> to vector<8x8xf32>
    %c0_11 = arith.constant 0 : index
    %c0_12 = arith.constant 0 : index
    %c0_13 = arith.constant 0 : index
    %8 = vector.load %arg6[%c0_11, %c0_12, %c0_13] : memref<1x8x16xf32, #tpu.memory_space<vmem>>, vector<1x8x16xf32>
    %9 = vector.shape_cast %8 : vector<1x8x16xf32> to vector<8x16xf32>
    %cst = arith.constant 8.000000e+00 : f32
    %10 = math.sqrt %cst : f32
    %c0_14 = arith.constant 0 : index
    %c0_15 = arith.constant 0 : index
    %c0_16 = arith.constant 0 : index
    %11 = vector.load %arg7[%c0_14, %c0_15, %c0_16] : memref<4x32x32xf32, #tpu.memory_space<vmem>>, vector<4x32x32xf32>
    %c0_17 = arith.constant 0 : index
    %c0_18 = arith.constant 0 : index
    %12 = vector.load %arg8[%c0_17, %c0_18] : memref<4x32xf32, #tpu.memory_space<vmem>>, vector<4x32xf32>
    %c0_19 = arith.constant 0 : index
    %c0_20 = arith.constant 0 : index
    %c0_21 = arith.constant 0 : index
    %13 = vector.load %arg9[%c0_19, %c0_20, %c0_21] : memref<4x32x32xf32, #tpu.memory_space<vmem>>, vector<4x32x32xf32>
    %c0_22 = arith.constant 0 : index
    %c0_23 = arith.constant 0 : index
    %14 = vector.load %arg10[%c0_22, %c0_23] : memref<4x32xf32, #tpu.memory_space<vmem>>, vector<4x32xf32>
    %c0_24 = arith.constant 0 : index
    %c0_25 = arith.constant 0 : index
    %15 = vector.load %arg11[%c0_24, %c0_25] : memref<3x32xf32, #tpu.memory_space<vmem>>, vector<3x32xf32>
    %c0_26 = arith.constant 0 : index
    %c0_27 = arith.constant 0 : index
    %16 = vector.load %arg12[%c0_26, %c0_27] : memref<3x32xf32, #tpu.memory_space<vmem>>, vector<3x32xf32>
    %17 = vector.extract_strided_slice %11 {offsets = [0, 0, 0], sizes = [1, 32, 32], strides = [1, 1, 1]} : vector<4x32x32xf32> to vector<1x32x32xf32>
    %18 = vector.shape_cast %17 : vector<1x32x32xf32> to vector<32x32xf32>
    %cst_28 = arith.constant dense<0.000000e+00> : vector<8x32xf32>
    %19 = tpu.matmul %1, %18, %cst_28 {dimension_numbers = #tpu.dot_dimension_numbers<[1], [0], [0], [1], [0, 0, 1, 1], [], []>} : vector<8x32xf32>, vector<32x32xf32>, vector<8x32xf32> -> vector<8x32xf32>
    %20 = vector.extract_strided_slice %12 {offsets = [0, 0], sizes = [1, 32], strides = [1, 1]} : vector<4x32xf32> to vector<1x32xf32>
    %21 = vector.shape_cast %20 : vector<1x32xf32> to vector<32xf32>
    %22 = vector.shape_cast %21 : vector<32xf32> to vector<1x32xf32>
    %23 = vector.broadcast %22 : vector<1x32xf32> to vector<8x32xf32>
    %24 = arith.addf %19, %23 : vector<8x32xf32>
    %25 = vector.extract_strided_slice %11 {offsets = [1, 0, 0], sizes = [1, 32, 32], strides = [1, 1, 1]} : vector<4x32x32xf32> to vector<1x32x32xf32>
    %26 = vector.shape_cast %25 : vector<1x32x32xf32> to vector<32x32xf32>
    %cst_29 = arith.constant dense<0.000000e+00> : vector<8x32xf32>
    %27 = tpu.matmul %3, %26, %cst_29 {dimension_numbers = #tpu.dot_dimension_numbers<[1], [0], [0], [1], [0, 0, 1, 1], [], []>} : vector<8x32xf32>, vector<32x32xf32>, vector<8x32xf32> -> vector<8x32xf32>
    %28 = vector.extract_strided_slice %12 {offsets = [1, 0], sizes = [1, 32], strides = [1, 1]} : vector<4x32xf32> to vector<1x32xf32>
    %29 = vector.shape_cast %28 : vector<1x32xf32> to vector<32xf32>
    %30 = vector.shape_cast %29 : vector<32xf32> to vector<1x32xf32>
    %31 = vector.broadcast %30 : vector<1x32xf32> to vector<8x32xf32>
    %32 = arith.addf %27, %31 : vector<8x32xf32>
    %33 = vector.extract_strided_slice %11 {offsets = [2, 0, 0], sizes = [1, 32, 32], strides = [1, 1, 1]} : vector<4x32x32xf32> to vector<1x32x32xf32>
    %34 = vector.shape_cast %33 : vector<1x32x32xf32> to vector<32x32xf32>
    %cst_30 = arith.constant dense<0.000000e+00> : vector<8x32xf32>
    %35 = tpu.matmul %3, %34, %cst_30 {dimension_numbers = #tpu.dot_dimension_numbers<[1], [0], [0], [1], [0, 0, 1, 1], [], []>} : vector<8x32xf32>, vector<32x32xf32>, vector<8x32xf32> -> vector<8x32xf32>
    %36 = vector.extract_strided_slice %12 {offsets = [2, 0], sizes = [1, 32], strides = [1, 1]} : vector<4x32xf32> to vector<1x32xf32>
    %37 = vector.shape_cast %36 : vector<1x32xf32> to vector<32xf32>
    %38 = vector.shape_cast %37 : vector<32xf32> to vector<1x32xf32>
    %39 = vector.broadcast %38 : vector<1x32xf32> to vector<8x32xf32>
    %40 = arith.addf %35, %39 : vector<8x32xf32>
    %41 = vector.extract_strided_slice %24 {offsets = [0, 0], sizes = [8, 8], strides = [1, 1]} : vector<8x32xf32> to vector<8x8xf32>
    %c0_31 = arith.constant 0 : index
    %c0_32 = arith.constant 0 : index
    %c0_33 = arith.constant 0 : index
    %42 = vector.load %arg19[%c0_31, %c0_32, %c0_33] : memref<4x8x8xf32, #tpu.memory_space<vmem>>, vector<1x8x8xf32>
    %43 = vector.shape_cast %42 : vector<1x8x8xf32> to vector<8x8xf32>
    %44 = vector.shape_cast %41 : vector<8x8xf32> to vector<1x8x8xf32>
    tpu.vector_store %arg19[%c0_31, %c0_32, %c0_33], %44 {strides = array<i32>} : memref<4x8x8xf32, #tpu.memory_space<vmem>>, vector<1x8x8xf32>,
    %45 = vector.extract_strided_slice %32 {offsets = [0, 0], sizes = [8, 8], strides = [1, 1]} : vector<8x32xf32> to vector<8x8xf32>
    %c0_34 = arith.constant 0 : index
    %c0_35 = arith.constant 0 : index
    %c0_36 = arith.constant 0 : index
    %46 = vector.load %arg20[%c0_34, %c0_35, %c0_36] : memref<4x16x8xf32, #tpu.memory_space<vmem>>, vector<1x8x8xf32>
    %47 = vector.shape_cast %46 : vector<1x8x8xf32> to vector<8x8xf32>
    %48 = vector.shape_cast %45 : vector<8x8xf32> to vector<1x8x8xf32>
    tpu.vector_store %arg20[%c0_34, %c0_35, %c0_36], %48 {strides = array<i32>} : memref<4x16x8xf32, #tpu.memory_space<vmem>>, vector<1x8x8xf32>,
    %49 = vector.extract_strided_slice %40 {offsets = [0, 0], sizes = [8, 8], strides = [1, 1]} : vector<8x32xf32> to vector<8x8xf32>
    %c0_37 = arith.constant 0 : index
    %c0_38 = arith.constant 0 : index
    %c0_39 = arith.constant 0 : index
    %50 = vector.load %arg21[%c0_37, %c0_38, %c0_39] : memref<4x16x8xf32, #tpu.memory_space<vmem>>, vector<1x8x8xf32>
    %51 = vector.shape_cast %50 : vector<1x8x8xf32> to vector<8x8xf32>
    %52 = vector.shape_cast %49 : vector<8x8xf32> to vector<1x8x8xf32>
    tpu.vector_store %arg21[%c0_37, %c0_38, %c0_39], %52 {strides = array<i32>} : memref<4x16x8xf32, #tpu.memory_space<vmem>>, vector<1x8x8xf32>,
    %53 = vector.extract_strided_slice %24 {offsets = [0, 8], sizes = [8, 8], strides = [1, 1]} : vector<8x32xf32> to vector<8x8xf32>
    %c1 = arith.constant 1 : index
    %c0_40 = arith.constant 0 : index
    %c0_41 = arith.constant 0 : index
    %54 = vector.load %arg19[%c1, %c0_40, %c0_41] : memref<4x8x8xf32, #tpu.memory_space<vmem>>, vector<1x8x8xf32>
    %55 = vector.shape_cast %54 : vector<1x8x8xf32> to vector<8x8xf32>
    %56 = vector.shape_cast %53 : vector<8x8xf32> to vector<1x8x8xf32>
    tpu.vector_store %arg19[%c1, %c0_40, %c0_41], %56 {strides = array<i32>} : memref<4x8x8xf32, #tpu.memory_space<vmem>>, vector<1x8x8xf32>,
    %57 = vector.extract_strided_slice %32 {offsets = [0, 8], sizes = [8, 8], strides = [1, 1]} : vector<8x32xf32> to vector<8x8xf32>
    %c1_42 = arith.constant 1 : index
    %c0_43 = arith.constant 0 : index
    %c0_44 = arith.constant 0 : index
    %58 = vector.load %arg20[%c1_42, %c0_43, %c0_44] : memref<4x16x8xf32, #tpu.memory_space<vmem>>, vector<1x8x8xf32>
    %59 = vector.shape_cast %58 : vector<1x8x8xf32> to vector<8x8xf32>
    %60 = vector.shape_cast %57 : vector<8x8xf32> to vector<1x8x8xf32>
    tpu.vector_store %arg20[%c1_42, %c0_43, %c0_44], %60 {strides = array<i32>} : memref<4x16x8xf32, #tpu.memory_space<vmem>>, vector<1x8x8xf32>,
    %61 = vector.extract_strided_slice %40 {offsets = [0, 8], sizes = [8, 8], strides = [1, 1]} : vector<8x32xf32> to vector<8x8xf32>
    %c1_45 = arith.constant 1 : index
    %c0_46 = arith.constant 0 : index
    %c0_47 = arith.constant 0 : index
    %62 = vector.load %arg21[%c1_45, %c0_46, %c0_47] : memref<4x16x8xf32, #tpu.memory_space<vmem>>, vector<1x8x8xf32>
    %63 = vector.shape_cast %62 : vector<1x8x8xf32> to vector<8x8xf32>
    %64 = vector.shape_cast %61 : vector<8x8xf32> to vector<1x8x8xf32>
    tpu.vector_store %arg21[%c1_45, %c0_46, %c0_47], %64 {strides = array<i32>} : memref<4x16x8xf32, #tpu.memory_space<vmem>>, vector<1x8x8xf32>,
    %65 = vector.extract_strided_slice %24 {offsets = [0, 16], sizes = [8, 8], strides = [1, 1]} : vector<8x32xf32> to vector<8x8xf32>
    %c2 = arith.constant 2 : index
    %c0_48 = arith.constant 0 : index
    %c0_49 = arith.constant 0 : index
    %66 = vector.load %arg19[%c2, %c0_48, %c0_49] : memref<4x8x8xf32, #tpu.memory_space<vmem>>, vector<1x8x8xf32>
    %67 = vector.shape_cast %66 : vector<1x8x8xf32> to vector<8x8xf32>
    %68 = vector.shape_cast %65 : vector<8x8xf32> to vector<1x8x8xf32>
    tpu.vector_store %arg19[%c2, %c0_48, %c0_49], %68 {strides = array<i32>} : memref<4x8x8xf32, #tpu.memory_space<vmem>>, vector<1x8x8xf32>,
    %69 = vector.extract_strided_slice %32 {offsets = [0, 16], sizes = [8, 8], strides = [1, 1]} : vector<8x32xf32> to vector<8x8xf32>
    %c2_50 = arith.constant 2 : index
    %c0_51 = arith.constant 0 : index
    %c0_52 = arith.constant 0 : index
    %70 = vector.load %arg20[%c2_50, %c0_51, %c0_52] : memref<4x16x8xf32, #tpu.memory_space<vmem>>, vector<1x8x8xf32>
    %71 = vector.shape_cast %70 : vector<1x8x8xf32> to vector<8x8xf32>
    %72 = vector.shape_cast %69 : vector<8x8xf32> to vector<1x8x8xf32>
    tpu.vector_store %arg20[%c2_50, %c0_51, %c0_52], %72 {strides = array<i32>} : memref<4x16x8xf32, #tpu.memory_space<vmem>>, vector<1x8x8xf32>,
    %73 = vector.extract_strided_slice %40 {offsets = [0, 16], sizes = [8, 8], strides = [1, 1]} : vector<8x32xf32> to vector<8x8xf32>
    %c2_53 = arith.constant 2 : index
    %c0_54 = arith.constant 0 : index
    %c0_55 = arith.constant 0 : index
    %74 = vector.load %arg21[%c2_53, %c0_54, %c0_55] : memref<4x16x8xf32, #tpu.memory_space<vmem>>, vector<1x8x8xf32>
    %75 = vector.shape_cast %74 : vector<1x8x8xf32> to vector<8x8xf32>
    %76 = vector.shape_cast %73 : vector<8x8xf32> to vector<1x8x8xf32>
    tpu.vector_store %arg21[%c2_53, %c0_54, %c0_55], %76 {strides = array<i32>} : memref<4x16x8xf32, #tpu.memory_space<vmem>>, vector<1x8x8xf32>,
    %77 = vector.extract_strided_slice %24 {offsets = [0, 24], sizes = [8, 8], strides = [1, 1]} : vector<8x32xf32> to vector<8x8xf32>
    %c3 = arith.constant 3 : index
    %c0_56 = arith.constant 0 : index
    %c0_57 = arith.constant 0 : index
    %78 = vector.load %arg19[%c3, %c0_56, %c0_57] : memref<4x8x8xf32, #tpu.memory_space<vmem>>, vector<1x8x8xf32>
    %79 = vector.shape_cast %78 : vector<1x8x8xf32> to vector<8x8xf32>
    %80 = vector.shape_cast %77 : vector<8x8xf32> to vector<1x8x8xf32>
    tpu.vector_store %arg19[%c3, %c0_56, %c0_57], %80 {strides = array<i32>} : memref<4x8x8xf32, #tpu.memory_space<vmem>>, vector<1x8x8xf32>,
    %81 = vector.extract_strided_slice %32 {offsets = [0, 24], sizes = [8, 8], strides = [1, 1]} : vector<8x32xf32> to vector<8x8xf32>
    %c3_58 = arith.constant 3 : index
    %c0_59 = arith.constant 0 : index
    %c0_60 = arith.constant 0 : index
    %82 = vector.load %arg20[%c3_58, %c0_59, %c0_60] : memref<4x16x8xf32, #tpu.memory_space<vmem>>, vector<1x8x8xf32>
    %83 = vector.shape_cast %82 : vector<1x8x8xf32> to vector<8x8xf32>
    %84 = vector.shape_cast %81 : vector<8x8xf32> to vector<1x8x8xf32>
    tpu.vector_store %arg20[%c3_58, %c0_59, %c0_60], %84 {strides = array<i32>} : memref<4x16x8xf32, #tpu.memory_space<vmem>>, vector<1x8x8xf32>,
    %85 = vector.extract_strided_slice %40 {offsets = [0, 24], sizes = [8, 8], strides = [1, 1]} : vector<8x32xf32> to vector<8x8xf32>
    %c3_61 = arith.constant 3 : index
    %c0_62 = arith.constant 0 : index
    %c0_63 = arith.constant 0 : index
    %86 = vector.load %arg21[%c3_61, %c0_62, %c0_63] : memref<4x16x8xf32, #tpu.memory_space<vmem>>, vector<1x8x8xf32>
    %87 = vector.shape_cast %86 : vector<1x8x8xf32> to vector<8x8xf32>
    %88 = vector.shape_cast %85 : vector<8x8xf32> to vector<1x8x8xf32>
    tpu.vector_store %arg21[%c3_61, %c0_62, %c0_63], %88 {strides = array<i32>} : memref<4x16x8xf32, #tpu.memory_space<vmem>>, vector<1x8x8xf32>,
    %c0_64 = arith.constant 0 : index
    %c0_65 = arith.constant 0 : index
    %c0_66 = arith.constant 0 : index
    %89 = vector.load %arg19[%c0_64, %c0_65, %c0_66] : memref<4x8x8xf32, #tpu.memory_space<vmem>>, vector<4x8x8xf32>
    %c0_67 = arith.constant 0 : index
    %c0_68 = arith.constant 0 : index
    %c0_69 = arith.constant 0 : index
    %90 = vector.load %arg20[%c0_67, %c0_68, %c0_69] : memref<4x16x8xf32, #tpu.memory_space<vmem>>, vector<4x8x8xf32>
    %c0_70 = arith.constant 0 : index
    %c0_71 = arith.constant 0 : index
    %c0_72 = arith.constant 0 : index
    %91 = vector.load %arg21[%c0_70, %c0_71, %c0_72] : memref<4x16x8xf32, #tpu.memory_space<vmem>>, vector<4x8x8xf32>
    "tpu.trace_start"() <{level = 10 : i32, message = "hqd,hkd->hqk"}> : () -> ()
    %cst_73 = arith.constant dense<0.000000e+00> : vector<4x8x8xf32>
    %92 = tpu.matmul %89, %90, %cst_73 {dimension_numbers = #tpu.dot_dimension_numbers<[2], [2], [1], [1], [0, 0, 0, 1, 1, 1], [0], [0]>} : vector<4x8x8xf32>, vector<4x8x8xf32>, vector<4x8x8xf32> -> vector<4x8x8xf32>
    "tpu.trace_stop"() : () -> ()
    %93 = vector.broadcast %10 : f32 to vector<4x8x8xf32>
    %94 = arith.divf %92, %93 : vector<4x8x8xf32>
    %95 = vector.shape_cast %7 : vector<8x8xf32> to vector<1x8x8xf32>
    %96 = vector.broadcast %95 : vector<1x8x8xf32> to vector<4x8x8xf32>
    %97 = arith.addf %94, %96 : vector<4x8x8xf32>
    %cst_74 = arith.constant dense<0xFF800000> : vector<4x8xf32>
    %98 = vector.multi_reduction <maximumf>, %97, %cst_74 [2] : vector<4x8x8xf32> to vector<4x8xf32>
    %99 = vector.shape_cast %98 : vector<4x8xf32> to vector<4x8x1xf32>
    %100 = vector.broadcast %99 : vector<4x8x1xf32> to vector<4x8x8xf32>
    %101 = arith.subf %97, %100 : vector<4x8x8xf32>
    %102 = math.exp %101 : vector<4x8x8xf32>
    %cst_75 = arith.constant dense<0.000000e+00> : vector<4x8xf32>
    %103 = vector.multi_reduction <add>, %102, %cst_75 [2] : vector<4x8x8xf32> to vector<4x8xf32>
    %104 = vector.shape_cast %103 : vector<4x8xf32> to vector<4x8x1xf32>
    %105 = tpu.reciprocal %104 : vector<4x8x1xf32> -> vector<4x8x1xf32>
    %106 = vector.broadcast %105 : vector<4x8x1xf32> to vector<4x8x8xf32>
    %107 = arith.mulf %102, %106 : vector<4x8x8xf32>
    "tpu.trace_start"() <{level = 10 : i32, message = "hqk,hkd->hqd"}> : () -> ()
    %cst_76 = arith.constant dense<0.000000e+00> : vector<4x8x8xf32>
    %108 = tpu.matmul %107, %91, %cst_76 {dimension_numbers = #tpu.dot_dimension_numbers<[2], [1], [1], [2], [0, 0, 0, 1, 1, 2], [0], [0]>} : vector<4x8x8xf32>, vector<4x8x8xf32>, vector<4x8x8xf32> -> vector<4x8x8xf32>
    "tpu.trace_stop"() : () -> ()
    %109 = vector.extract_strided_slice %108 {offsets = [0, 0, 0], sizes = [1, 8, 8], strides = [1, 1, 1]} : vector<4x8x8xf32> to vector<1x8x8xf32>
    %110 = vector.shape_cast %109 : vector<1x8x8xf32> to vector<8x8xf32>
    %c0_77 = arith.constant 0 : index
    %c0_78 = arith.constant 0 : index
    %111 = vector.load %arg22[%c0_77, %c0_78] : memref<8x32xf32, #tpu.memory_space<vmem>>, vector<8x8xf32>
    tpu.vector_store %arg22[%c0_77, %c0_78], %110 {strides = array<i32>} : memref<8x32xf32, #tpu.memory_space<vmem>>, vector<8x8xf32>,
    %112 = vector.extract_strided_slice %108 {offsets = [1, 0, 0], sizes = [1, 8, 8], strides = [1, 1, 1]} : vector<4x8x8xf32> to vector<1x8x8xf32>
    %113 = vector.shape_cast %112 : vector<1x8x8xf32> to vector<8x8xf32>
    %c0_79 = arith.constant 0 : index
    %c8 = arith.constant 8 : index
    %114 = vector.load %arg22[%c0_79, %c8] : memref<8x32xf32, #tpu.memory_space<vmem>>, vector<8x8xf32>
    tpu.vector_store %arg22[%c0_79, %c8], %113 {strides = array<i32>} : memref<8x32xf32, #tpu.memory_space<vmem>>, vector<8x8xf32>,
    %115 = vector.extract_strided_slice %108 {offsets = [2, 0, 0], sizes = [1, 8, 8], strides = [1, 1, 1]} : vector<4x8x8xf32> to vector<1x8x8xf32>
    %116 = vector.shape_cast %115 : vector<1x8x8xf32> to vector<8x8xf32>
    %c0_80 = arith.constant 0 : index
    %c16 = arith.constant 16 : index
    %117 = vector.load %arg22[%c0_80, %c16] : memref<8x32xf32, #tpu.memory_space<vmem>>, vector<8x8xf32>
    tpu.vector_store %arg22[%c0_80, %c16], %116 {strides = array<i32>} : memref<8x32xf32, #tpu.memory_space<vmem>>, vector<8x8xf32>,
    %118 = vector.extract_strided_slice %108 {offsets = [3, 0, 0], sizes = [1, 8, 8], strides = [1, 1, 1]} : vector<4x8x8xf32> to vector<1x8x8xf32>
    %119 = vector.shape_cast %118 : vector<1x8x8xf32> to vector<8x8xf32>
    %c0_81 = arith.constant 0 : index
    %c24 = arith.constant 24 : index
    %120 = vector.load %arg22[%c0_81, %c24] : memref<8x32xf32, #tpu.memory_space<vmem>>, vector<8x8xf32>
    tpu.vector_store %arg22[%c0_81, %c24], %119 {strides = array<i32>} : memref<8x32xf32, #tpu.memory_space<vmem>>, vector<8x8xf32>,
    %c0_82 = arith.constant 0 : index
    %c0_83 = arith.constant 0 : index
    %121 = vector.load %arg22[%c0_82, %c0_83] : memref<8x32xf32, #tpu.memory_space<vmem>>, vector<8x32xf32>
    %122 = vector.extract_strided_slice %11 {offsets = [3, 0, 0], sizes = [1, 32, 32], strides = [1, 1, 1]} : vector<4x32x32xf32> to vector<1x32x32xf32>
    %123 = vector.shape_cast %122 : vector<1x32x32xf32> to vector<32x32xf32>
    %cst_84 = arith.constant dense<0.000000e+00> : vector<8x32xf32>
    %124 = tpu.matmul %121, %123, %cst_84 {dimension_numbers = #tpu.dot_dimension_numbers<[1], [0], [0], [1], [0, 0, 1, 1], [], []>} : vector<8x32xf32>, vector<32x32xf32>, vector<8x32xf32> -> vector<8x32xf32>
    %125 = vector.extract_strided_slice %12 {offsets = [3, 0], sizes = [1, 32], strides = [1, 1]} : vector<4x32xf32> to vector<1x32xf32>
    %126 = vector.shape_cast %125 : vector<1x32xf32> to vector<32xf32>
    %127 = vector.shape_cast %126 : vector<32xf32> to vector<1x32xf32>
    %128 = vector.broadcast %127 : vector<1x32xf32> to vector<8x32xf32>
    %129 = arith.addf %124, %128 : vector<8x32xf32>
    %130 = arith.addf %1, %129 : vector<8x32xf32>
    %131 = vector.extract_strided_slice %15 {offsets = [0, 0], sizes = [1, 32], strides = [1, 1]} : vector<3x32xf32> to vector<1x32xf32>
    %132 = vector.shape_cast %131 : vector<1x32xf32> to vector<32xf32>
    %133 = vector.extract_strided_slice %16 {offsets = [0, 0], sizes = [1, 32], strides = [1, 1]} : vector<3x32xf32> to vector<1x32xf32>
    %134 = vector.shape_cast %133 : vector<1x32xf32> to vector<32xf32>
    %cst_85 = arith.constant dense<0.000000e+00> : vector<8xf32>
    %135 = vector.multi_reduction <add>, %130, %cst_85 [1] : vector<8x32xf32> to vector<8xf32>
    %136 = vector.shape_cast %135 : vector<8xf32> to vector<8x1xf32>
    %cst_86 = arith.constant 3.200000e+01 : f32
    %137 = vector.broadcast %cst_86 : f32 to vector<8x1xf32>
    %138 = arith.divf %136, %137 : vector<8x1xf32>
    %139 = vector.broadcast %138 : vector<8x1xf32> to vector<8x32xf32>
    %140 = arith.subf %130, %139 : vector<8x32xf32>
    %141 = arith.mulf %140, %140 : vector<8x32xf32>
    %cst_87 = arith.constant dense<0.000000e+00> : vector<8xf32>
    %142 = vector.multi_reduction <add>, %141, %cst_87 [1] : vector<8x32xf32> to vector<8xf32>
    %143 = vector.shape_cast %142 : vector<8xf32> to vector<8x1xf32>
    %cst_88 = arith.constant 3.200000e+01 : f32
    %144 = vector.broadcast %cst_88 : f32 to vector<8x1xf32>
    %145 = arith.divf %143, %144 : vector<8x1xf32>
    %cst_89 = arith.constant 9.99999974E-6 : f32
    %146 = vector.broadcast %cst_89 : f32 to vector<8x1xf32>
    %147 = arith.addf %145, %146 : vector<8x1xf32>
    %148 = math.rsqrt %147 : vector<8x1xf32>
    %149 = vector.broadcast %148 : vector<8x1xf32> to vector<8x32xf32>
    %150 = arith.mulf %140, %149 : vector<8x32xf32>
    %151 = vector.shape_cast %132 : vector<32xf32> to vector<1x32xf32>
    %152 = vector.broadcast %151 : vector<1x32xf32> to vector<8x32xf32>
    %153 = arith.mulf %150, %152 : vector<8x32xf32>
    %154 = vector.shape_cast %134 : vector<32xf32> to vector<1x32xf32>
    %155 = vector.broadcast %154 : vector<1x32xf32> to vector<8x32xf32>
    %156 = arith.addf %153, %155 : vector<8x32xf32>
    %157 = vector.extract_strided_slice %13 {offsets = [0, 0, 0], sizes = [1, 32, 32], strides = [1, 1, 1]} : vector<4x32x32xf32> to vector<1x32x32xf32>
    %158 = vector.shape_cast %157 : vector<1x32x32xf32> to vector<32x32xf32>
    %cst_90 = arith.constant dense<0.000000e+00> : vector<8x32xf32>
    %159 = tpu.matmul %156, %158, %cst_90 {dimension_numbers = #tpu.dot_dimension_numbers<[1], [0], [0], [1], [0, 0, 1, 1], [], []>} : vector<8x32xf32>, vector<32x32xf32>, vector<8x32xf32> -> vector<8x32xf32>
    %160 = vector.extract_strided_slice %14 {offsets = [0, 0], sizes = [1, 32], strides = [1, 1]} : vector<4x32xf32> to vector<1x32xf32>
    %161 = vector.shape_cast %160 : vector<1x32xf32> to vector<32xf32>
    %162 = vector.shape_cast %161 : vector<32xf32> to vector<1x32xf32>
    %163 = vector.broadcast %162 : vector<1x32xf32> to vector<8x32xf32>
    %164 = arith.addf %159, %163 : vector<8x32xf32>
    %165 = vector.extract_strided_slice %13 {offsets = [1, 0, 0], sizes = [1, 32, 32], strides = [1, 1, 1]} : vector<4x32x32xf32> to vector<1x32x32xf32>
    %166 = vector.shape_cast %165 : vector<1x32x32xf32> to vector<32x32xf32>
    %cst_91 = arith.constant dense<0.000000e+00> : vector<16x32xf32>
    %167 = tpu.matmul %5, %166, %cst_91 {dimension_numbers = #tpu.dot_dimension_numbers<[1], [0], [0], [1], [0, 0, 1, 1], [], []>} : vector<16x32xf32>, vector<32x32xf32>, vector<16x32xf32> -> vector<16x32xf32>
    %168 = vector.extract_strided_slice %14 {offsets = [1, 0], sizes = [1, 32], strides = [1, 1]} : vector<4x32xf32> to vector<1x32xf32>
    %169 = vector.shape_cast %168 : vector<1x32xf32> to vector<32xf32>
    %170 = vector.shape_cast %169 : vector<32xf32> to vector<1x32xf32>
    %171 = vector.broadcast %170 : vector<1x32xf32> to vector<16x32xf32>
    %172 = arith.addf %167, %171 : vector<16x32xf32>
    %173 = vector.extract_strided_slice %13 {offsets = [2, 0, 0], sizes = [1, 32, 32], strides = [1, 1, 1]} : vector<4x32x32xf32> to vector<1x32x32xf32>
    %174 = vector.shape_cast %173 : vector<1x32x32xf32> to vector<32x32xf32>
    %cst_92 = arith.constant dense<0.000000e+00> : vector<16x32xf32>
    %175 = tpu.matmul %5, %174, %cst_92 {dimension_numbers = #tpu.dot_dimension_numbers<[1], [0], [0], [1], [0, 0, 1, 1], [], []>} : vector<16x32xf32>, vector<32x32xf32>, vector<16x32xf32> -> vector<16x32xf32>
    %176 = vector.extract_strided_slice %14 {offsets = [2, 0], sizes = [1, 32], strides = [1, 1]} : vector<4x32xf32> to vector<1x32xf32>
    %177 = vector.shape_cast %176 : vector<1x32xf32> to vector<32xf32>
    %178 = vector.shape_cast %177 : vector<32xf32> to vector<1x32xf32>
    %179 = vector.broadcast %178 : vector<1x32xf32> to vector<16x32xf32>
    %180 = arith.addf %175, %179 : vector<16x32xf32>
    %181 = vector.extract_strided_slice %164 {offsets = [0, 0], sizes = [8, 8], strides = [1, 1]} : vector<8x32xf32> to vector<8x8xf32>
    %c0_93 = arith.constant 0 : index
    %c0_94 = arith.constant 0 : index
    %c0_95 = arith.constant 0 : index
    %182 = vector.load %arg19[%c0_93, %c0_94, %c0_95] : memref<4x8x8xf32, #tpu.memory_space<vmem>>, vector<1x8x8xf32>
    %183 = vector.shape_cast %182 : vector<1x8x8xf32> to vector<8x8xf32>
    %184 = vector.shape_cast %181 : vector<8x8xf32> to vector<1x8x8xf32>
    tpu.vector_store %arg19[%c0_93, %c0_94, %c0_95], %184 {strides = array<i32>} : memref<4x8x8xf32, #tpu.memory_space<vmem>>, vector<1x8x8xf32>,
    %185 = vector.extract_strided_slice %172 {offsets = [0, 0], sizes = [16, 8], strides = [1, 1]} : vector<16x32xf32> to vector<16x8xf32>
    %c0_96 = arith.constant 0 : index
    %c0_97 = arith.constant 0 : index
    %c0_98 = arith.constant 0 : index
    %186 = vector.load %arg20[%c0_96, %c0_97, %c0_98] : memref<4x16x8xf32, #tpu.memory_space<vmem>>, vector<1x16x8xf32>
    %187 = vector.shape_cast %186 : vector<1x16x8xf32> to vector<16x8xf32>
    %188 = vector.shape_cast %185 : vector<16x8xf32> to vector<1x16x8xf32>
    tpu.vector_store %arg20[%c0_96, %c0_97, %c0_98], %188 {strides = array<i32>} : memref<4x16x8xf32, #tpu.memory_space<vmem>>, vector<1x16x8xf32>,
    %189 = vector.extract_strided_slice %180 {offsets = [0, 0], sizes = [16, 8], strides = [1, 1]} : vector<16x32xf32> to vector<16x8xf32>
    %c0_99 = arith.constant 0 : index
    %c0_100 = arith.constant 0 : index
    %c0_101 = arith.constant 0 : index
    %190 = vector.load %arg21[%c0_99, %c0_100, %c0_101] : memref<4x16x8xf32, #tpu.memory_space<vmem>>, vector<1x16x8xf32>
    %191 = vector.shape_cast %190 : vector<1x16x8xf32> to vector<16x8xf32>
    %192 = vector.shape_cast %189 : vector<16x8xf32> to vector<1x16x8xf32>
    tpu.vector_store %arg21[%c0_99, %c0_100, %c0_101], %192 {strides = array<i32>} : memref<4x16x8xf32, #tpu.memory_space<vmem>>, vector<1x16x8xf32>,
    %193 = vector.extract_strided_slice %164 {offsets = [0, 8], sizes = [8, 8], strides = [1, 1]} : vector<8x32xf32> to vector<8x8xf32>
    %c1_102 = arith.constant 1 : index
    %c0_103 = arith.constant 0 : index
    %c0_104 = arith.constant 0 : index
    %194 = vector.load %arg19[%c1_102, %c0_103, %c0_104] : memref<4x8x8xf32, #tpu.memory_space<vmem>>, vector<1x8x8xf32>
    %195 = vector.shape_cast %194 : vector<1x8x8xf32> to vector<8x8xf32>
    %196 = vector.shape_cast %193 : vector<8x8xf32> to vector<1x8x8xf32>
    tpu.vector_store %arg19[%c1_102, %c0_103, %c0_104], %196 {strides = array<i32>} : memref<4x8x8xf32, #tpu.memory_space<vmem>>, vector<1x8x8xf32>,
    %197 = vector.extract_strided_slice %172 {offsets = [0, 8], sizes = [16, 8], strides = [1, 1]} : vector<16x32xf32> to vector<16x8xf32>
    %c1_105 = arith.constant 1 : index
    %c0_106 = arith.constant 0 : index
    %c0_107 = arith.constant 0 : index
    %198 = vector.load %arg20[%c1_105, %c0_106, %c0_107] : memref<4x16x8xf32, #tpu.memory_space<vmem>>, vector<1x16x8xf32>
    %199 = vector.shape_cast %198 : vector<1x16x8xf32> to vector<16x8xf32>
    %200 = vector.shape_cast %197 : vector<16x8xf32> to vector<1x16x8xf32>
    tpu.vector_store %arg20[%c1_105, %c0_106, %c0_107], %200 {strides = array<i32>} : memref<4x16x8xf32, #tpu.memory_space<vmem>>, vector<1x16x8xf32>,
    %201 = vector.extract_strided_slice %180 {offsets = [0, 8], sizes = [16, 8], strides = [1, 1]} : vector<16x32xf32> to vector<16x8xf32>
    %c1_108 = arith.constant 1 : index
    %c0_109 = arith.constant 0 : index
    %c0_110 = arith.constant 0 : index
    %202 = vector.load %arg21[%c1_108, %c0_109, %c0_110] : memref<4x16x8xf32, #tpu.memory_space<vmem>>, vector<1x16x8xf32>
    %203 = vector.shape_cast %202 : vector<1x16x8xf32> to vector<16x8xf32>
    %204 = vector.shape_cast %201 : vector<16x8xf32> to vector<1x16x8xf32>
    tpu.vector_store %arg21[%c1_108, %c0_109, %c0_110], %204 {strides = array<i32>} : memref<4x16x8xf32, #tpu.memory_space<vmem>>, vector<1x16x8xf32>,
    %205 = vector.extract_strided_slice %164 {offsets = [0, 16], sizes = [8, 8], strides = [1, 1]} : vector<8x32xf32> to vector<8x8xf32>
    %c2_111 = arith.constant 2 : index
    %c0_112 = arith.constant 0 : index
    %c0_113 = arith.constant 0 : index
    %206 = vector.load %arg19[%c2_111, %c0_112, %c0_113] : memref<4x8x8xf32, #tpu.memory_space<vmem>>, vector<1x8x8xf32>
    %207 = vector.shape_cast %206 : vector<1x8x8xf32> to vector<8x8xf32>
    %208 = vector.shape_cast %205 : vector<8x8xf32> to vector<1x8x8xf32>
    tpu.vector_store %arg19[%c2_111, %c0_112, %c0_113], %208 {strides = array<i32>} : memref<4x8x8xf32, #tpu.memory_space<vmem>>, vector<1x8x8xf32>,
    %209 = vector.extract_strided_slice %172 {offsets = [0, 16], sizes = [16, 8], strides = [1, 1]} : vector<16x32xf32> to vector<16x8xf32>
    %c2_114 = arith.constant 2 : index
    %c0_115 = arith.constant 0 : index
    %c0_116 = arith.constant 0 : index
    %210 = vector.load %arg20[%c2_114, %c0_115, %c0_116] : memref<4x16x8xf32, #tpu.memory_space<vmem>>, vector<1x16x8xf32>
    %211 = vector.shape_cast %210 : vector<1x16x8xf32> to vector<16x8xf32>
    %212 = vector.shape_cast %209 : vector<16x8xf32> to vector<1x16x8xf32>
    tpu.vector_store %arg20[%c2_114, %c0_115, %c0_116], %212 {strides = array<i32>} : memref<4x16x8xf32, #tpu.memory_space<vmem>>, vector<1x16x8xf32>,
    %213 = vector.extract_strided_slice %180 {offsets = [0, 16], sizes = [16, 8], strides = [1, 1]} : vector<16x32xf32> to vector<16x8xf32>
    %c2_117 = arith.constant 2 : index
    %c0_118 = arith.constant 0 : index
    %c0_119 = arith.constant 0 : index
    %214 = vector.load %arg21[%c2_117, %c0_118, %c0_119] : memref<4x16x8xf32, #tpu.memory_space<vmem>>, vector<1x16x8xf32>
    %215 = vector.shape_cast %214 : vector<1x16x8xf32> to vector<16x8xf32>
    %216 = vector.shape_cast %213 : vector<16x8xf32> to vector<1x16x8xf32>
    tpu.vector_store %arg21[%c2_117, %c0_118, %c0_119], %216 {strides = array<i32>} : memref<4x16x8xf32, #tpu.memory_space<vmem>>, vector<1x16x8xf32>,
    %217 = vector.extract_strided_slice %164 {offsets = [0, 24], sizes = [8, 8], strides = [1, 1]} : vector<8x32xf32> to vector<8x8xf32>
    %c3_120 = arith.constant 3 : index
    %c0_121 = arith.constant 0 : index
    %c0_122 = arith.constant 0 : index
    %218 = vector.load %arg19[%c3_120, %c0_121, %c0_122] : memref<4x8x8xf32, #tpu.memory_space<vmem>>, vector<1x8x8xf32>
    %219 = vector.shape_cast %218 : vector<1x8x8xf32> to vector<8x8xf32>
    %220 = vector.shape_cast %217 : vector<8x8xf32> to vector<1x8x8xf32>
    tpu.vector_store %arg19[%c3_120, %c0_121, %c0_122], %220 {strides = array<i32>} : memref<4x8x8xf32, #tpu.memory_space<vmem>>, vector<1x8x8xf32>,
    %221 = vector.extract_strided_slice %172 {offsets = [0, 24], sizes = [16, 8], strides = [1, 1]} : vector<16x32xf32> to vector<16x8xf32>
    %c3_123 = arith.constant 3 : index
    %c0_124 = arith.constant 0 : index
    %c0_125 = arith.constant 0 : index
    %222 = vector.load %arg20[%c3_123, %c0_124, %c0_125] : memref<4x16x8xf32, #tpu.memory_space<vmem>>, vector<1x16x8xf32>
    %223 = vector.shape_cast %222 : vector<1x16x8xf32> to vector<16x8xf32>
    %224 = vector.shape_cast %221 : vector<16x8xf32> to vector<1x16x8xf32>
    tpu.vector_store %arg20[%c3_123, %c0_124, %c0_125], %224 {strides = array<i32>} : memref<4x16x8xf32, #tpu.memory_space<vmem>>, vector<1x16x8xf32>,
    %225 = vector.extract_strided_slice %180 {offsets = [0, 24], sizes = [16, 8], strides = [1, 1]} : vector<16x32xf32> to vector<16x8xf32>
    %c3_126 = arith.constant 3 : index
    %c0_127 = arith.constant 0 : index
    %c0_128 = arith.constant 0 : index
    %226 = vector.load %arg21[%c3_126, %c0_127, %c0_128] : memref<4x16x8xf32, #tpu.memory_space<vmem>>, vector<1x16x8xf32>
    %227 = vector.shape_cast %226 : vector<1x16x8xf32> to vector<16x8xf32>
    %228 = vector.shape_cast %225 : vector<16x8xf32> to vector<1x16x8xf32>
    tpu.vector_store %arg21[%c3_126, %c0_127, %c0_128], %228 {strides = array<i32>} : memref<4x16x8xf32, #tpu.memory_space<vmem>>, vector<1x16x8xf32>,
    %c0_129 = arith.constant 0 : index
    %c0_130 = arith.constant 0 : index
    %c0_131 = arith.constant 0 : index
    %229 = vector.load %arg19[%c0_129, %c0_130, %c0_131] : memref<4x8x8xf32, #tpu.memory_space<vmem>>, vector<4x8x8xf32>
    %c0_132 = arith.constant 0 : index
    %c0_133 = arith.constant 0 : index
    %c0_134 = arith.constant 0 : index
    %230 = vector.load %arg20[%c0_132, %c0_133, %c0_134] : memref<4x16x8xf32, #tpu.memory_space<vmem>>, vector<4x16x8xf32>
    %c0_135 = arith.constant 0 : index
    %c0_136 = arith.constant 0 : index
    %c0_137 = arith.constant 0 : index
    %231 = vector.load %arg21[%c0_135, %c0_136, %c0_137] : memref<4x16x8xf32, #tpu.memory_space<vmem>>, vector<4x16x8xf32>
    "tpu.trace_start"() <{level = 10 : i32, message = "hqd,hkd->hqk"}> : () -> ()
    %cst_138 = arith.constant dense<0.000000e+00> : vector<4x8x16xf32>
    %232 = tpu.matmul %229, %230, %cst_138 {dimension_numbers = #tpu.dot_dimension_numbers<[2], [2], [1], [1], [0, 0, 0, 1, 1, 1], [0], [0]>} : vector<4x8x8xf32>, vector<4x16x8xf32>, vector<4x8x16xf32> -> vector<4x8x16xf32>
    "tpu.trace_stop"() : () -> ()
    %233 = vector.broadcast %10 : f32 to vector<4x8x16xf32>
    %234 = arith.divf %232, %233 : vector<4x8x16xf32>
    %235 = vector.shape_cast %9 : vector<8x16xf32> to vector<1x8x16xf32>
    %236 = vector.broadcast %235 : vector<1x8x16xf32> to vector<4x8x16xf32>
    %237 = arith.addf %234, %236 : vector<4x8x16xf32>
    %cst_139 = arith.constant dense<0xFF800000> : vector<4x8xf32>
    %238 = vector.multi_reduction <maximumf>, %237, %cst_139 [2] : vector<4x8x16xf32> to vector<4x8xf32>
    %239 = vector.shape_cast %238 : vector<4x8xf32> to vector<4x8x1xf32>
    %240 = vector.broadcast %239 : vector<4x8x1xf32> to vector<4x8x16xf32>
    %241 = arith.subf %237, %240 : vector<4x8x16xf32>
    %242 = math.exp %241 : vector<4x8x16xf32>
    %cst_140 = arith.constant dense<0.000000e+00> : vector<4x8xf32>
    %243 = vector.multi_reduction <add>, %242, %cst_140 [2] : vector<4x8x16xf32> to vector<4x8xf32>
    %244 = vector.shape_cast %243 : vector<4x8xf32> to vector<4x8x1xf32>
    %245 = tpu.reciprocal %244 : vector<4x8x1xf32> -> vector<4x8x1xf32>
    %246 = vector.broadcast %245 : vector<4x8x1xf32> to vector<4x8x16xf32>
    %247 = arith.mulf %242, %246 : vector<4x8x16xf32>
    "tpu.trace_start"() <{level = 10 : i32, message = "hqk,hkd->hqd"}> : () -> ()
    %cst_141 = arith.constant dense<0.000000e+00> : vector<4x8x8xf32>
    %248 = tpu.matmul %247, %231, %cst_141 {dimension_numbers = #tpu.dot_dimension_numbers<[2], [1], [1], [2], [0, 0, 0, 1, 1, 2], [0], [0]>} : vector<4x8x16xf32>, vector<4x16x8xf32>, vector<4x8x8xf32> -> vector<4x8x8xf32>
    "tpu.trace_stop"() : () -> ()
    %249 = vector.extract_strided_slice %248 {offsets = [0, 0, 0], sizes = [1, 8, 8], strides = [1, 1, 1]} : vector<4x8x8xf32> to vector<1x8x8xf32>
    %250 = vector.shape_cast %249 : vector<1x8x8xf32> to vector<8x8xf32>
    %c0_142 = arith.constant 0 : index
    %c0_143 = arith.constant 0 : index
    %251 = vector.load %arg22[%c0_142, %c0_143] : memref<8x32xf32, #tpu.memory_space<vmem>>, vector<8x8xf32>
    tpu.vector_store %arg22[%c0_142, %c0_143], %250 {strides = array<i32>} : memref<8x32xf32, #tpu.memory_space<vmem>>, vector<8x8xf32>,
    %252 = vector.extract_strided_slice %248 {offsets = [1, 0, 0], sizes = [1, 8, 8], strides = [1, 1, 1]} : vector<4x8x8xf32> to vector<1x8x8xf32>
    %253 = vector.shape_cast %252 : vector<1x8x8xf32> to vector<8x8xf32>
    %c0_144 = arith.constant 0 : index
    %c8_145 = arith.constant 8 : index
    %254 = vector.load %arg22[%c0_144, %c8_145] : memref<8x32xf32, #tpu.memory_space<vmem>>, vector<8x8xf32>
    tpu.vector_store %arg22[%c0_144, %c8_145], %253 {strides = array<i32>} : memref<8x32xf32, #tpu.memory_space<vmem>>, vector<8x8xf32>,
    %255 = vector.extract_strided_slice %248 {offsets = [2, 0, 0], sizes = [1, 8, 8], strides = [1, 1, 1]} : vector<4x8x8xf32> to vector<1x8x8xf32>
    %256 = vector.shape_cast %255 : vector<1x8x8xf32> to vector<8x8xf32>
    %c0_146 = arith.constant 0 : index
    %c16_147 = arith.constant 16 : index
    %257 = vector.load %arg22[%c0_146, %c16_147] : memref<8x32xf32, #tpu.memory_space<vmem>>, vector<8x8xf32>
    tpu.vector_store %arg22[%c0_146, %c16_147], %256 {strides = array<i32>} : memref<8x32xf32, #tpu.memory_space<vmem>>, vector<8x8xf32>,
    %258 = vector.extract_strided_slice %248 {offsets = [3, 0, 0], sizes = [1, 8, 8], strides = [1, 1, 1]} : vector<4x8x8xf32> to vector<1x8x8xf32>
    %259 = vector.shape_cast %258 : vector<1x8x8xf32> to vector<8x8xf32>
    %c0_148 = arith.constant 0 : index
    %c24_149 = arith.constant 24 : index
    %260 = vector.load %arg22[%c0_148, %c24_149] : memref<8x32xf32, #tpu.memory_space<vmem>>, vector<8x8xf32>
    tpu.vector_store %arg22[%c0_148, %c24_149], %259 {strides = array<i32>} : memref<8x32xf32, #tpu.memory_space<vmem>>, vector<8x8xf32>,
    %c0_150 = arith.constant 0 : index
    %c0_151 = arith.constant 0 : index
    %261 = vector.load %arg22[%c0_150, %c0_151] : memref<8x32xf32, #tpu.memory_space<vmem>>, vector<8x32xf32>
    %262 = vector.extract_strided_slice %13 {offsets = [3, 0, 0], sizes = [1, 32, 32], strides = [1, 1, 1]} : vector<4x32x32xf32> to vector<1x32x32xf32>
    %263 = vector.shape_cast %262 : vector<1x32x32xf32> to vector<32x32xf32>
    %cst_152 = arith.constant dense<0.000000e+00> : vector<8x32xf32>
    %264 = tpu.matmul %261, %263, %cst_152 {dimension_numbers = #tpu.dot_dimension_numbers<[1], [0], [0], [1], [0, 0, 1, 1], [], []>} : vector<8x32xf32>, vector<32x32xf32>, vector<8x32xf32> -> vector<8x32xf32>
    %265 = vector.extract_strided_slice %14 {offsets = [3, 0], sizes = [1, 32], strides = [1, 1]} : vector<4x32xf32> to vector<1x32xf32>
    %266 = vector.shape_cast %265 : vector<1x32xf32> to vector<32xf32>
    %267 = vector.shape_cast %266 : vector<32xf32> to vector<1x32xf32>
    %268 = vector.broadcast %267 : vector<1x32xf32> to vector<8x32xf32>
    %269 = arith.addf %264, %268 : vector<8x32xf32>
    %c0_153 = arith.constant 0 : index
    %c0_154 = arith.constant 0 : index
    %c0_155 = arith.constant 0 : index
    %c0_156 = arith.constant 0 : index
    %270 = vector.load %arg18[%c0_153, %c0_154, %c0_155, %c0_156] : memref<1x4x8x16xf32, #tpu.memory_space<vmem>>, vector<1x4x8x16xf32>
    %271 = vector.shape_cast %270 : vector<1x4x8x16xf32> to vector<4x8x16xf32>
    %272 = vector.shape_cast %247 : vector<4x8x16xf32> to vector<1x4x8x16xf32>
    tpu.vector_store %arg18[%c0_153, %c0_154, %c0_155, %c0_156], %272 {strides = array<i32>} : memref<1x4x8x16xf32, #tpu.memory_space<vmem>>, vector<1x4x8x16xf32>,
    %273 = arith.addf %156, %269 : vector<8x32xf32>
    %274 = vector.extract_strided_slice %15 {offsets = [1, 0], sizes = [1, 32], strides = [1, 1]} : vector<3x32xf32> to vector<1x32xf32>
    %275 = vector.shape_cast %274 : vector<1x32xf32> to vector<32xf32>
    %276 = vector.extract_strided_slice %16 {offsets = [1, 0], sizes = [1, 32], strides = [1, 1]} : vector<3x32xf32> to vector<1x32xf32>
    %277 = vector.shape_cast %276 : vector<1x32xf32> to vector<32xf32>
    %cst_157 = arith.constant dense<0.000000e+00> : vector<8xf32>
    %278 = vector.multi_reduction <add>, %273, %cst_157 [1] : vector<8x32xf32> to vector<8xf32>
    %279 = vector.shape_cast %278 : vector<8xf32> to vector<8x1xf32>
    %cst_158 = arith.constant 3.200000e+01 : f32
    %280 = vector.broadcast %cst_158 : f32 to vector<8x1xf32>
    %281 = arith.divf %279, %280 : vector<8x1xf32>
    %282 = vector.broadcast %281 : vector<8x1xf32> to vector<8x32xf32>
    %283 = arith.subf %273, %282 : vector<8x32xf32>
    %284 = arith.mulf %283, %283 : vector<8x32xf32>
    %cst_159 = arith.constant dense<0.000000e+00> : vector<8xf32>
    %285 = vector.multi_reduction <add>, %284, %cst_159 [1] : vector<8x32xf32> to vector<8xf32>
    %286 = vector.shape_cast %285 : vector<8xf32> to vector<8x1xf32>
    %cst_160 = arith.constant 3.200000e+01 : f32
    %287 = vector.broadcast %cst_160 : f32 to vector<8x1xf32>
    %288 = arith.divf %286, %287 : vector<8x1xf32>
    %cst_161 = arith.constant 9.99999974E-6 : f32
    %289 = vector.broadcast %cst_161 : f32 to vector<8x1xf32>
    %290 = arith.addf %288, %289 : vector<8x1xf32>
    %291 = math.rsqrt %290 : vector<8x1xf32>
    %292 = vector.broadcast %291 : vector<8x1xf32> to vector<8x32xf32>
    %293 = arith.mulf %283, %292 : vector<8x32xf32>
    %294 = vector.shape_cast %275 : vector<32xf32> to vector<1x32xf32>
    %295 = vector.broadcast %294 : vector<1x32xf32> to vector<8x32xf32>
    %296 = arith.mulf %293, %295 : vector<8x32xf32>
    %297 = vector.shape_cast %277 : vector<32xf32> to vector<1x32xf32>
    %298 = vector.broadcast %297 : vector<1x32xf32> to vector<8x32xf32>
    %299 = arith.addf %296, %298 : vector<8x32xf32>
    %c0_162 = arith.constant 0 : index
    %c0_163 = arith.constant 0 : index
    %300 = vector.load %arg13[%c0_162, %c0_163] : memref<32x64xf32, #tpu.memory_space<vmem>>, vector<32x64xf32>
    %cst_164 = arith.constant dense<0.000000e+00> : vector<8x64xf32>
    %301 = tpu.matmul %299, %300, %cst_164 {dimension_numbers = #tpu.dot_dimension_numbers<[1], [0], [0], [1], [0, 0, 1, 1], [], []>} : vector<8x32xf32>, vector<32x64xf32>, vector<8x64xf32> -> vector<8x64xf32>
    %c0_165 = arith.constant 0 : index
    %c0_166 = arith.constant 0 : index
    %302 = vector.load %arg14[%c0_165, %c0_166] : memref<1x64xf32, #tpu.memory_space<vmem>>, vector<1x64xf32>
    %303 = vector.broadcast %302 : vector<1x64xf32> to vector<8x64xf32>
    %304 = arith.addf %301, %303 : vector<8x64xf32>
    %cst_167 = arith.constant 0.000000e+00 : f32
    %305 = vector.broadcast %cst_167 : f32 to vector<8x64xf32>
    %306 = arith.maximumf %304, %305 : vector<8x64xf32>
    %c0_168 = arith.constant 0 : index
    %c0_169 = arith.constant 0 : index
    %307 = vector.load %arg15[%c0_168, %c0_169] : memref<64x32xf32, #tpu.memory_space<vmem>>, vector<64x32xf32>
    %cst_170 = arith.constant dense<0.000000e+00> : vector<8x32xf32>
    %308 = tpu.matmul %306, %307, %cst_170 {dimension_numbers = #tpu.dot_dimension_numbers<[1], [0], [0], [1], [0, 0, 1, 1], [], []>} : vector<8x64xf32>, vector<64x32xf32>, vector<8x32xf32> -> vector<8x32xf32>
    %c0_171 = arith.constant 0 : index
    %c0_172 = arith.constant 0 : index
    %309 = vector.load %arg16[%c0_171, %c0_172] : memref<1x32xf32, #tpu.memory_space<vmem>>, vector<1x32xf32>
    %310 = vector.broadcast %309 : vector<1x32xf32> to vector<8x32xf32>
    %311 = arith.addf %308, %310 : vector<8x32xf32>
    %312 = arith.addf %299, %311 : vector<8x32xf32>
    %313 = vector.extract_strided_slice %15 {offsets = [2, 0], sizes = [1, 32], strides = [1, 1]} : vector<3x32xf32> to vector<1x32xf32>
    %314 = vector.shape_cast %313 : vector<1x32xf32> to vector<32xf32>
    %315 = vector.extract_strided_slice %16 {offsets = [2, 0], sizes = [1, 32], strides = [1, 1]} : vector<3x32xf32> to vector<1x32xf32>
    %316 = vector.shape_cast %315 : vector<1x32xf32> to vector<32xf32>
    %cst_173 = arith.constant dense<0.000000e+00> : vector<8xf32>
    %317 = vector.multi_reduction <add>, %312, %cst_173 [1] : vector<8x32xf32> to vector<8xf32>
    %318 = vector.shape_cast %317 : vector<8xf32> to vector<8x1xf32>
    %cst_174 = arith.constant 3.200000e+01 : f32
    %319 = vector.broadcast %cst_174 : f32 to vector<8x1xf32>
    %320 = arith.divf %318, %319 : vector<8x1xf32>
    %321 = vector.broadcast %320 : vector<8x1xf32> to vector<8x32xf32>
    %322 = arith.subf %312, %321 : vector<8x32xf32>
    %323 = arith.mulf %322, %322 : vector<8x32xf32>
    %cst_175 = arith.constant dense<0.000000e+00> : vector<8xf32>
    %324 = vector.multi_reduction <add>, %323, %cst_175 [1] : vector<8x32xf32> to vector<8xf32>
    %325 = vector.shape_cast %324 : vector<8xf32> to vector<8x1xf32>
    %cst_176 = arith.constant 3.200000e+01 : f32
    %326 = vector.broadcast %cst_176 : f32 to vector<8x1xf32>
    %327 = arith.divf %325, %326 : vector<8x1xf32>
    %cst_177 = arith.constant 9.99999974E-6 : f32
    %328 = vector.broadcast %cst_177 : f32 to vector<8x1xf32>
    %329 = arith.addf %327, %328 : vector<8x1xf32>
    %330 = math.rsqrt %329 : vector<8x1xf32>
    %331 = vector.broadcast %330 : vector<8x1xf32> to vector<8x32xf32>
    %332 = arith.mulf %322, %331 : vector<8x32xf32>
    %333 = vector.shape_cast %314 : vector<32xf32> to vector<1x32xf32>
    %334 = vector.broadcast %333 : vector<1x32xf32> to vector<8x32xf32>
    %335 = arith.mulf %332, %334 : vector<8x32xf32>
    %336 = vector.shape_cast %316 : vector<32xf32> to vector<1x32xf32>
    %337 = vector.broadcast %336 : vector<1x32xf32> to vector<8x32xf32>
    %338 = arith.addf %335, %337 : vector<8x32xf32>
    %c0_178 = arith.constant 0 : index
    %c0_179 = arith.constant 0 : index
    %c0_180 = arith.constant 0 : index
    %339 = vector.load %arg17[%c0_178, %c0_179, %c0_180] : memref<1x8x32xf32, #tpu.memory_space<vmem>>, vector<1x8x32xf32>
    %340 = vector.shape_cast %339 : vector<1x8x32xf32> to vector<8x32xf32>
    %341 = vector.shape_cast %338 : vector<8x32xf32> to vector<1x8x32xf32>
    tpu.vector_store %arg17[%c0_178, %c0_179, %c0_180], %341 {strides = array<i32>} : memref<1x8x32xf32, #tpu.memory_space<vmem>>, vector<1x8x32xf32>,
    return
  }
  func.func @transform_0(%arg0: i32, %arg1: i32) -> (i32, i32, i32) {
    %c0_i32 = arith.constant 0 : i32
    %c0_i32_0 = arith.constant 0 : i32
    return %arg0, %arg1, %c0_i32 : i32, i32, i32
  }
  func.func @transform_1(%arg0: i32, %arg1: i32) -> (i32, i32, i32) {
    %c0_i32 = arith.constant 0 : i32
    %c0_i32_0 = arith.constant 0 : i32
    %c0_i32_1 = arith.constant 0 : i32
    return %arg0, %c0_i32, %c0_i32_0 : i32, i32, i32
  }
  func.func @transform_2(%arg0: i32, %arg1: i32) -> (i32, i32, i32) {
    %c0_i32 = arith.constant 0 : i32
    %c0_i32_0 = arith.constant 0 : i32
    %c0_i32_1 = arith.constant 0 : i32
    return %arg0, %c0_i32, %c0_i32_0 : i32, i32, i32
  }
  func.func @transform_3(%arg0: i32, %arg1: i32) -> (i32, i32, i32) {
    %c0_i32 = arith.constant 0 : i32
    %c0_i32_0 = arith.constant 0 : i32
    return %arg0, %arg1, %c0_i32 : i32, i32, i32
  }
  func.func @transform_4(%arg0: i32, %arg1: i32) -> (i32, i32, i32) {
    %c0_i32 = arith.constant 0 : i32
    %c0_i32_0 = arith.constant 0 : i32
    return %arg0, %arg1, %c0_i32 : i32, i32, i32
  }
  func.func @transform_5(%arg0: i32, %arg1: i32) -> (i32, i32, i32) {
    %c0_i32 = arith.constant 0 : i32
    %c0_i32_0 = arith.constant 0 : i32
    %c0_i32_1 = arith.constant 0 : i32
    %c0_i32_2 = arith.constant 0 : i32
    return %c0_i32, %c0_i32_0, %c0_i32_1 : i32, i32, i32
  }
  func.func @transform_6(%arg0: i32, %arg1: i32) -> (i32, i32) {
    %c0_i32 = arith.constant 0 : i32
    %c0_i32_0 = arith.constant 0 : i32
    %c0_i32_1 = arith.constant 0 : i32
    return %c0_i32, %c0_i32_0 : i32, i32
  }
  func.func @transform_7(%arg0: i32, %arg1: i32) -> (i32, i32, i32) {
    %c0_i32 = arith.constant 0 : i32
    %c0_i32_0 = arith.constant 0 : i32
    %c0_i32_1 = arith.constant 0 : i32
    %c0_i32_2 = arith.constant 0 : i32
    return %c0_i32, %c0_i32_0, %c0_i32_1 : i32, i32, i32
  }
  func.func @transform_8(%arg0: i32, %arg1: i32) -> (i32, i32) {
    %c0_i32 = arith.constant 0 : i32
    %c0_i32_0 = arith.constant 0 : i32
    %c0_i32_1 = arith.constant 0 : i32
    return %c0_i32, %c0_i32_0 : i32, i32
  }
  func.func @transform_9(%arg0: i32, %arg1: i32) -> (i32, i32) {
    %c0_i32 = arith.constant 0 : i32
    %c0_i32_0 = arith.constant 0 : i32
    %c0_i32_1 = arith.constant 0 : i32
    return %c0_i32, %c0_i32_0 : i32, i32
  }
  func.func @transform_10(%arg0: i32, %arg1: i32) -> (i32, i32) {
    %c0_i32 = arith.constant 0 : i32
    %c0_i32_0 = arith.constant 0 : i32
    %c0_i32_1 = arith.constant 0 : i32
    return %c0_i32, %c0_i32_0 : i32, i32
  }
  func.func @transform_11(%arg0: i32, %arg1: i32) -> (i32, i32) {
    %c0_i32 = arith.constant 0 : i32
    %c0_i32_0 = arith.constant 0 : i32
    %c0_i32_1 = arith.constant 0 : i32
    return %c0_i32, %c0_i32_0 : i32, i32
  }
  func.func @transform_12(%arg0: i32, %arg1: i32) -> (i32, i32) {
    %c0_i32 = arith.constant 0 : i32
    %c0_i32_0 = arith.constant 0 : i32
    %c0_i32_1 = arith.constant 0 : i32
    return %c0_i32, %c0_i32_0 : i32, i32
  }
  func.func @transform_13(%arg0: i32, %arg1: i32) -> (i32, i32) {
    %c0_i32 = arith.constant 0 : i32
    %c0_i32_0 = arith.constant 0 : i32
    %c0_i32_1 = arith.constant 0 : i32
    return %c0_i32, %c0_i32_0 : i32, i32
  }
  func.func @transform_14(%arg0: i32, %arg1: i32) -> (i32, i32) {
    %c0_i32 = arith.constant 0 : i32
    %c0_i32_0 = arith.constant 0 : i32
    %c0_i32_1 = arith.constant 0 : i32
    return %c0_i32, %c0_i32_0 : i32, i32
  }
  func.func @transform_15(%arg0: i32, %arg1: i32) -> (i32, i32, i32) {
    %c0_i32 = arith.constant 0 : i32
    %c0_i32_0 = arith.constant 0 : i32
    return %arg0, %arg1, %c0_i32 : i32, i32, i32
  }
  func.func @transform_16(%arg0: i32, %arg1: i32) -> (i32, i32, i32, i32) {
    %c0_i32 = arith.constant 0 : i32
    %c0_i32_0 = arith.constant 0 : i32
    %c0_i32_1 = arith.constant 0 : i32
    return %arg0, %c0_i32, %arg1, %c0_i32_0 : i32, i32, i32, i32
  }
}

</mosaic_0001>

<bundles_post_ra>
// kernel: tpu_custom_call.1
= control target key start
LH: loop header
LB: loop body
LE: loop exit
PB: predicated region body
PF: predicated region fallthrough
CT: control target
= control target key end

     0   :  { %s4843_s0 = inlined_call_operand.vmem [shape: f32[2,8,32], index: 0, kind: input, shape index: {}]   ;;  %s4844_s1 = inlined_call_operand.vmem [shape: f32[2,8,32], index: 1, kind: input, shape index: {}]   ;;  %s4845_s2 = inlined_call_operand.vmem [shape: f32[2,16,32], index: 2, kind: input, shape index: {}]   ;;  %s4846_s3 = inlined_call_operand.hbm [shape: f32[2,8,8], index: 3, kind: input, shape index: {}]   ;;  %s4847_s4 = inlined_call_operand.hbm [shape: f32[2,8,16], index: 4, kind: input, shape index: {}]   ;;  %s4848_s5 = inlined_call_operand.hbm [shape: f32[4,32,32], index: 5, kind: input, shape index: {}]   ;;  %s4849_s6 = inlined_call_operand.vmem [shape: f32[4,32], index: 6, kind: input, shape index: {}]   ;;  %s4850_s7 = inlined_call_operand.hbm [shape: f32[4,32,32], index: 7, kind: input, shape index: {}]   ;;  %s4851_s8 = inlined_call_operand.vmem [shape: f32[4,32], index: 8, kind: input, shape index: {}]   ;;  %s4852_s9 = inlined_call_operand.vmem [shape: f32[3,32], index: 9, kind: input, shape index: {}]   ;;  %s4853_s10 = inlined_call_operand.vmem [shape: f32[3,32], index: 10, kind: input, shape index: {}]   ;;  %s4854_s11 = inlined_call_operand.vmem [shape: f32[32,64], index: 11, kind: input, shape index: {}]   ;;  %s4855_s12 = inlined_call_operand.vmem [shape: f32[1,64], index: 12, kind: input, shape index: {}]   ;;  %s4856_s13 = inlined_call_operand.vmem [shape: f32[64,32], index: 13, kind: input, shape index: {}]   ;;  %s4857_s14 = inlined_call_operand.vmem [shape: f32[1,32], index: 14, kind: input, shape index: {}]   ;;  %s4858_s15 = inlined_call_operand.hbm [shape: f32[2,8,32], index: 15, kind: output, shape index: {0}]   ;;  %s4859_s16 = inlined_call_operand.hbm [shape: f32[2,4,8,16], index: 16, kind: output, shape index: {1}]  }
   0x1   :  { %4868 = sst [smem:[#allocation27_spill]] %s4843_s0 }
   0x2   :  { %4869 = sst [smem:[#allocation28_spill]] %s4846_s3 }
   0x3   :  { %4870 = sst [smem:[#allocation29_spill]] %s4847_s4 }
   0x4   :  { %4871 = sst [smem:[#allocation30_spill]] %s4848_s5 }
   0x5   :  { %4872 = sst [smem:[#allocation31_spill]] %s4850_s7 }
   0x6   :  { %4873 = sst [smem:[#allocation32_spill]] %s4855_s12 }
   0x7   :  { %4874 = sst [smem:[#allocation33_spill]] %s4856_s13 }
   0x8   :  { %4875 = sst [smem:[#allocation34_spill]] %s4857_s14 }
   0x9   :  { %4876 = sst [smem:[#allocation35_spill]] %s4858_s15 }
   0xa   :  { %4877 = sst [smem:[#allocation36_spill]] %s4859_s16 }
   0xb   :  { %22 = vsyncpa [#allocation7], 0 }
   0xc   :  { %24 = vsyncpa [#allocation7 + $0x1], 0 }
   0xd   :  { %25 = vsyncpa [#allocation10], 0 }
   0xe   :  { %27 = vsyncpa [#allocation10 + $0x1], 0 }
   0xf   :  { %28 = vsyncpa [#allocation13], 0 }
  0x10   :  { %29 = vsyncpa [#allocation8], 0 }
  0x11   :  { %31 = vsyncpa [#allocation8 + $0x1], 0 }
  0x12   :  { %32 = vsyncpa [#allocation16], 0 }
  0x13   :  { %34 = vsyncpa [#allocation16 + $0x1], 0  ;;  %s4211_s21 = smov 0   ;;  %s4213_s22 = smov 0  }
  0x14   :  { %s4215_s23 = smov 0   ;;  %s4217_s24 = smov 0  }
  0x15   :  { %s4219_s25 = smov 0   ;;  %s4221_s26 = smov 0  }
  0x16 LB: > { %4878 = sst [smem:[#allocation23_spill]] %s4087_s21  ;;  %s4242_s27 = sadd.s32 4294967295, %s4107_s26   ;;  %s4107_s26 = sphi %s4221_s26, %s40_s26   ;;  %s4103_s25 = sphi %s4219_s25, %s4908_s25   ;;  %s4099_s24 = sphi %s4217_s24, %s4907_s24   ;;  %s4095_s23 = sphi %s4215_s23, %s4911_s23   ;;  %s4091_s22 = sphi %s4213_s22, %s4910_s22   ;;  %s4087_s21 = sphi %s4211_s21, %s4909_s21  }
  0x17   : > { %4879 = sst [smem:[#allocation24_spill]] %s4103_s25  ;;  %s3354_s28 = sadd.s32 4294967294, %s4107_s26  }
  0x18   : > { %p154_p0 = scmp.ne.s32.totalorder %s4091_s22, %s4087_s21  ;;  %p4864_p1 = scmp.eq.s32.totalorder %s4242_s27, 0 }
  0x19   : > { %p424_p3 = scmp.eq.s32.totalorder %s3354_s28, 1  ;;  %p3355_p5 = scmp.ge.s32.totalorder %s4107_s26, 1 }
  0x1a   : > { %p4251_p4 = por %p4864_p1, %p154_p0  ;;  %p459_p7 = scmp.lt.s32.totalorder %s4107_s26, 3 }
  0x1b   : > { %p4256_p6 = por %p424_p3, %p154_p0  ;;  %s4109_s17 = smov [#allocation11]  }
  0x1c   : > { %p4261_p8 = pnand %p3355_p5, %p459_p7  ;;  %s471_s18 = sshll.u32 %s4109_s17, 4  ;;  %s472_s18 = int_to_ptr.vmem [resolvable:$true] %s471_s18 }
  0x1d   : > { %s4881_s30 = scalar_select %p4256_p6, 1, 0 }
  0x1e   : > { %p3751_p9 = pneg %p4261_p8  ;;  %s4110_s20 = smov [#allocation12]  }
  0x1f   : > { %4882 = sst [smem:[#allocation25_spill]] %s4881_s30  ;;  %s487_s28 = sshll.u32 %s4110_s20, 4  ;;  %s488_s28 = int_to_ptr.vmem [resolvable:$true] %s487_s28 }
  0x20   : > { %p4270_p11 = pnand %p3751_p9, %p4864_p1  ;;  %s3888_s30 = scalar_lea.vmem %s472_s18, 2048 }
  0x21   : > { %p3889_p13 = scmp.ne.s32.totalorder %s472_s18, %s3888_s30  ;;  %p3896_p5 = scmp.lt.s32.totalorder %s472_s18, %s472_s18 }
  0x22   : > { %p3879_p12 = pneg %p4270_p11  ;;  %p3897_p7 = scmp.lt.s32.totalorder %s3888_s30, %s3888_s30 }
  0x24   : > { %p3891_p0 = pnand %p3889_p13, %p3879_p12  ;;  %p3898_p10 = por %p3897_p7, %p3896_p5 }
  0x26   : > { %p3892_p3 = pneg %p3891_p0 }
  0x28   : > { %p3899_p9 = pnand %p3898_p10, %p3892_p3 }
  0x2a   : > { %3902 = shalt.err (!%p3899_p9)
}
  0x2b   : > { %s4111_s17 = smov 128   ;;  %s4112_s21 = smov 8  }
  0x2c   : > { %s4885_s5 = sld [smem:[#allocation30_spill]]  ;;  %s3914_s16 = scalar_lea.vmem %s488_s28, 2048 }
  0x2d   : > { %p3915_p1 = scmp.ne.s32.totalorder %s488_s28, %s3914_s16  ;;  %p3922_p2 = scmp.lt.s32.totalorder %s488_s28, %s488_s28 }
  0x2e   : > { %p3923_p6 = scmp.lt.s32.totalorder %s3914_s16, %s3914_s16 }
  0x2f   : > { %p3917_p13 = pnand %p3915_p1, %p3879_p12 }
  0x30   : > { %p3924_p5 = por %p3923_p6, %p3922_p2 }
  0x31   : > { %p3918_p0 = pneg %p3917_p13 }
  0x32   : > { %3754 = dma.hbm_to_vmem [thread:$0]  (!%p4270_p11), %s4885_s5, 2048, %s472_s18, [#allocation10], %s4111_s17, %s4111_s17, %s4112_s21  }
  0x33   : > { %p3925_p10 = pnand %p3924_p5, %p3918_p0 }
  0x35   : > { %3928 = shalt.err (!%p3925_p10)
}
  0x36   : > { %s4886_s7 = sld [smem:[#allocation31_spill]]  ;;  %s52_s15 = sadd.s32 1, %s4103_s25 }
  0x37   : > { %s141_s16 = sadd.s32 1, %s4095_s23  ;;  %p54_p1 = scmp.ge.s32.totalorder %s52_s15, 2 }
  0x38   : > { %p148_p2 = scmp.ne.s32.totalorder %s4095_s23, %s4091_s22  ;;  %p149_p6 = scmp.eq.s32.totalorder %s4107_s26, 0 }
  0x39   : > { %p3774_p12 = scmp.lt.s32.totalorder %s4107_s26, 2  ;;  %s4913_s15 = smov (%p54_p1, %s52_s15), 0 }
  0x3a   : > { %4887 = sst [smem:[#allocation26_spill]] %s4913_s15  ;;  %p150_p3 = por %p149_p6, %p148_p2 }
  0x3b   : > { %p4888_p7 = scmp.eq.s32.totalorder %s4242_s27, 1  ;;  %s136_s18 = ssub.s32 %s4103_s25, %s4913_s15 }
  0x3c   : > { %3757 = dma.hbm_to_vmem [thread:$0]  (!%p4270_p11), %s4886_s7, 2048, %s488_s28, [#allocation13], %s4111_s17, %s4111_s17, %s4112_s21  }
  0x3d   : > { %p4302_p9 = por %p4888_p7, %p148_p2  ;;  %s547_s19 = sand.u32 1, %s4095_s23  }
  0x3e   : > { %p139_p13 = scmp.eq.s32.totalorder %s136_s18, 0  ;;  %s3359_s21 = sshll.u32 %s547_s19, 3 }
  0x3f   : > { %s3360_s28 = sshll.u32 %s4103_s25, 7  ;;  %s4890_s3 = sld [smem:[#allocation28_spill]] }
  0x40   : > { %s4311_s17 = scalar_select %p139_p13, %s4095_s23, %s141_s16  }
  0x41   : > { %s551_s7 = scalar_lea.vmem [#allocation6], %s3359_s21  ;;  %p4318_p11 = pnand %p3774_p12, %p150_p3 }
  0x42   : > { %s559_s12 = sshll.u32 %s551_s7, 4  ;;  %s4892_s4 = sld [smem:[#allocation29_spill]]  ;;  %s560_s12 = int_to_ptr.vmem [resolvable:$true] %s559_s12 }
  0x43   : > { %s548_s16 = scalar_lea.sflag [#allocation7], %s547_s19  ;;  %p3931_p0 = pneg %p4318_p11 }
  0x44   : > { %s3942_s20 = scalar_lea.vmem %s560_s12, 128  ;;  %s4113_s7 = smov [#allocation6]  }
  0x45   : > { %s557_s5 = scalar_lea.hbm %s4890_s3, %s3360_s28  ;;  %p3943_p5 = scmp.ne.s32.totalorder %s560_s12, %s3942_s20 }
  0x46   : > { %s3947_s30 = sshll.u32 %s4113_s7, 4  ;;  %s3948_s30 = int_to_ptr.vmem [resolvable:$false] %s3947_s30 }
  0x47   : > { %p3945_p10 = pnand %p3943_p5, %p3931_p0  ;;  %s3949_s3 = scalar_lea.vmem %s3948_s30, 256 }
  0x48   : > { %s4325_s25 = scalar_lea.hbm %s4892_s4, %s3360_s28  ;;  %p3950_p2 = scmp.lt.s32.totalorder %s560_s12, %s3948_s30 }
  0x49   : > { %p3946_p1 = pneg %p3945_p10  ;;  %p3951_p6 = scmp.lt.s32.totalorder %s3949_s3, %s3942_s20 }
  0x4b   : > { %p3952_p12 = por %p3951_p6, %p3950_p2 }
  0x4d   : > { %p3953_p3 = pnand %p3952_p12, %p3946_p1 }
  0x4f   : > { %3956 = shalt.err (!%p3953_p3)
}
  0x50   : > { %3761 = dma.hbm_to_vmem [thread:$0]  (!%p4318_p11), %s557_s5, 128, %s560_s12, %s548_s16  }
  0x51   : > { %s566_s15 = sand.u32 1, %s4107_s26   ;;  %s570_s19 = scalar_lea.vmem [#allocation9], %s3359_s21 }
  0x52   : > { %s578_s28 = sshll.u32 %s570_s19, 4  ;;  %s567_s18 = scalar_lea.sflag [#allocation10], %s566_s15  ;;  %s579_s28 = int_to_ptr.vmem [resolvable:$true] %s578_s28 }
  0x53   : > { %s3970_s4 = scalar_lea.vmem %s579_s28, 128  ;;  %s4114_s3 = smov [#allocation9]  }
  0x54   : > { %p3971_p7 = scmp.ne.s32.totalorder %s579_s28, %s3970_s4  ;;  %s3975_s20 = sshll.u32 %s4114_s3, 4  ;;  %s3976_s20 = int_to_ptr.vmem [resolvable:$false] %s3975_s20 }
  0x55   : > { %s3977_s7 = scalar_lea.vmem %s3976_s20, 256  ;;  %p3978_p10 = scmp.lt.s32.totalorder %s579_s28, %s3976_s20 }
  0x56   : > { %p3973_p13 = pnand %p3971_p7, %p3931_p0  ;;  %p3979_p1 = scmp.lt.s32.totalorder %s3977_s7, %s3970_s4 }
  0x58   : > { %p3974_p5 = pneg %p3973_p13  ;;  %p3980_p2 = por %p3979_p1, %p3978_p10 }
  0x5a   : > { %p3981_p6 = pnand %p3980_p2, %p3974_p5 }
  0x5c   : > { %3984 = shalt.err (!%p3981_p6)
}
  0x5d   : > { %3764 = dma.hbm_to_vmem [thread:$0]  (!%p4318_p11), %s4325_s25, 128, %s579_s28, %s567_s18  }
  0x5e   : > { %587 = sbr.rel (%p4261_p8) target bundleno = 4160 (0x1040), region = 80  ;;  %s4344_s5 = sand.u32 (!%p4261_p8), 1, %s4091_s22  }
  0x5f   : > { %s4347_s12 = sshll.u32 (!%p4261_p8), %s4344_s5, 3  ;;  %s590_s4 = scalar_lea.sflag (!%p4261_p8), [#allocation7], %s4344_s5 }
  0x60   : > { %s593_s21 = scalar_lea.vmem (!%p4261_p8), [#allocation6], %s4347_s12 }
  0x63   : > { %4062 = dma.done.wait (%p4251_p4), %s590_s4, 128  }
  0x64   : > { %4064 = vsyncadd (%p4251_p4), %s590_s4, 4294967168  ;;  %s598_s13 = sand.u32 1, %s4242_s27   ;;  %s602_s0 = scalar_lea.vmem [#allocation9], %s4347_s12 }
  0x65   : > { %s599_s25 = scalar_lea.sflag [#allocation10], %s598_s13 }
  0x66   : > { %4066 = dma.done.wait (%p4251_p4), %s599_s25, 128  }
  0x67   : > { %4068 = vsyncadd (%p4251_p4), %s599_s25, 4294967168  ;;  %p4893_p8 = scmp.eq.s32.totalorder %s4242_s27, 0 }
  0x69   : > { %4070 = dma.done.wait (%p4893_p8), [#allocation10], 2048   ;;  %p4894_p11 = pmov %p4893_p8 }
  0x6a   : > { %p4895_p0 = pmov %p4893_p8 }
  0x6b   : > { %4072 = vsyncadd (%p4894_p11), [#allocation10], 4294965248 }
  0x6c   : > { %4074 = dma.done.wait (%p4895_p0), [#allocation13], 2048   ;;  %p4896_p12 = pmov %p4895_p0 }
  0x6d   : > { %p685_p3 = scmp.lt.s32.totalorder %s4099_s24, 1  ;;  %v4115_v0 = vmov 0.0   ;;  %vm4116_vm0 = vmmov 0   ;;  %v710_v1 = vld [vmem:[#allocation11 + $0x18] sm:$0xff]  ;;  %v709_v2 = vld [vmem:[#allocation11 + $0x10] sm:$0xff]  ;;  %v708_v3 = vld [vmem:[#allocation11 + $0x8] sm:$0xff]  ;;  %v743_v11 = vlaneseq }
  0x6e   : > { %4076 = vsyncadd (%p4896_p12), [#allocation13], 4294965248  ;;  %3521 = vmatprep.subr.mxu1 %v4115_v0  ;;  %3529 = vmatprep.mubr.msk.f32.mxu1 %vm4116_vm0, %v4115_v0  ;;  %s4897_s15 = sld [smem:[#allocation27_spill]]  ;;  %v707_v4 = vld [vmem:[#allocation11] sm:$0xff]  ;;  %vm747_vm1 = vcmask 261120   ;;  %v714_v6 = vld [vmem:[#allocation11 + $0x38] sm:$0xff] }
  0x6f   : > { %s4374_s29 = scalar_select %p685_p3, %s4099_s24, 1  ;;  %3543 = vmatprep.subr.mxu0 %v4115_v0  ;;  %3551 = vmatprep.mubr.msk.f32.mxu0 %vm4116_vm0, %v4115_v0  ;;  %v713_v7 = vld [vmem:[#allocation11 + $0x30] sm:$0xff]  ;;  %v712_v8 = vld [vmem:[#allocation11 + $0x28] sm:$0xff]  ;;  %v711_v9 = vld [vmem:[#allocation11 + $0x20] sm:$0xff]  ;;  %v4403_v12 = vshrl.u32 %v743_v11, 7  ;;  %vm972_vm2 = vcmask 64512  }
  0x70   : > { %3522 = vmatpush3.msra.mxu1 %v710_v1  ;;  %v4411_v14 = vld [vmem:[%s4849_s6] sm:$0xf]  ;;  %v717_v17 = vld [vmem:[#allocation11 + $0x50] sm:$0xff]  ;;  %v716_v22 = vld [vmem:[#allocation11 + $0x48] sm:$0xff]  ;;  %s4117_s4 = smov 112   ;;  %s4118_s13 = smov 120  }
  0x71   : > { %s3370_s27 = sshll.u32 %s4374_s29, 3  ;;  %3523 = vmatprep.subr.mxu1 %v4115_v0  ;;  %v4406_v13 = vsub.s32 0, %v4403_v12  ;;  %v718_v16 = vld [vmem:[#allocation11 + $0x58] sm:$0xff]  ;;  %v4417_v20 = vsub.s32 1, %v4403_v12  ;;  %v715_v23 = vld [vmem:[#allocation11 + $0x40] sm:$0xff]  ;;  %s4119_s25 = smov 104  }
  0x72   : > { %3524 = vmatpush3.msra.mxu1 %v709_v2  ;;  %s695_s3 = scalar_lea.vmem %s4844_s1, %s3370_s27  ;;  %3544 = vmatpush3.msra.mxu0 %v718_v16  ;;  %v4462_v42 = vsub.s32 2, %v4403_v12  ;;  %v705_v49 = vld [vmem:[%s593_s21] sm:$0xff]  ;;  %s4120_s21 = smov 8   ;;  %vm1690_vm3 = vcmask 130112   ;;  %vm1696_vm4 = vcmask 195712   ;;  %vm1702_vm5 = vcmask 261312  }
  0x73   : > { %3525 = vmatprep.subr.mxu1 %v4115_v0  ;;  %v702_v10 = vld [vmem:[%s695_s3] sm:$0xff]  ;;  %v746_v15 = vrot.slane %v4411_v14, %v4406_v13  ;;  %3545 = vmatprep.subr.mxu0 %v4115_v0  ;;  %v824_v24 = vrot.slane %v4411_v14, %v4417_v20  ;;  %s4122_s16 = smov 24   ;;  %s3423_s30 = sshll.u32 %s4374_s29, 4  ;;  %vm2462_vm6 = vcmask 130048   ;;  %vm3021_vm7 = vcmask 523264  }
  0x74   : > { %s691_s19 = scalar_lea.vmem %s4897_s15, %s3370_s27  ;;  %3526 = vmatpush3.msra.mxu1 %v708_v3  ;;  %3546 = vmatpush3.msra.mxu0 %v717_v17  ;;  %v901_v43 = vrot.slane %v4411_v14, %v4462_v42  ;;  %s4121_s27 = smov 16  }
  0x75   : > { %v4385_v5 = vld [vmem:[%s691_s19] sm:$0xff]  ;;  %3527 = vmatprep.subr.mxu1 %v4115_v0  ;;  %3547 = vmatprep.subr.mxu0 %v4115_v0  ;;  %s700_s28 = scalar_lea.vmem %s4845_s2, %s3423_s30  ;;  %s4898_s20 = sld [smem:[#allocation33_spill]] }
  0x76   : > { %3528 = vmatpush3.msra.mxu1 %v707_v4  ;;  %3548 = vmatpush3.msra.mxu0 %v716_v22  ;;  %s3424_s15 = sshll.u32 %s4099_s24, 9  ;;  %s4901_s18 = sld [smem:[#allocation36_spill]] }
  0x77   : > { %3530 = vmatmul.mubr.msk.f32.vlgmr.msra.gmra.mxu1 %vm747_vm1, %v4385_v5  ;;  %3532 = vmatprep.subr.mxu1 %v4115_v0  ;;  %s3126_s7 = scalar_lea.sflag [#allocation16], %s4344_s5 }
  0x78   : > { %3533 = vmatpush3.msra.mxu1 %v714_v6  ;;  %3540 = vmatprep.mubr.msk.f32.mxu1 %vm4116_vm0, %v4115_v0 }
  0x79   : > { %3534 = vmatprep.subr.mxu1 %v4115_v0  ;;  %3549 = vmatprep.subr.mxu0 %v4115_v0 }
  0x7a   : > { %3535 = vmatpush3.msra.mxu1 %v713_v7  ;;  %3550 = vmatpush3.msra.mxu0 %v715_v23 }
  0x7b   : > { %3536 = vmatprep.subr.mxu1 %v4115_v0  ;;  %3564 = vmatprep.subr.mxu0 %v4115_v0 }
  0x7c   : > { %3537 = vmatpush3.msra.mxu1 %v712_v8  ;;  %3552 = vmatmul.mubr.msk.f32.vlgmr.msra.gmra.mxu0 %vm747_vm1, %v702_v10  ;;  %s4769_s3 = scalar_lea.hbm %s4901_s18, %s3424_s15 }
  0x7d   : > { %3538 = vmatprep.subr.mxu1 %v4115_v0  ;;  %3566 = vmatprep.mubr.msk.f32.mxu0 %vm4116_vm0, %v4115_v0 }
  0x7e   : > { %3539 = vmatpush3.msra.mxu1 %v711_v9 }
  0x7f   : > { %3541 = vmatmul.mubr.msk.f32.vlgmr.msra.gmra.mxu1 %vm747_vm1, %v702_v10  ;;  %3554 = vmatprep.subr.mxu1 %v4115_v0 }
  0x80   : > { %3556 = vmatprep.mubr.msk.f32.mxu1 %vm4116_vm0, %v4115_v0 }
 0x137   : > { %v817_v18 = vpop.f32.mrf.mxu1 }
 0x138   : > { %v818_v19 = vadd.f32 %v817_v18, %v746_v15 }
 0x139   : > { %v3531_v21 = vpop.f32.mrf.mxu1 }
 0x13a   : > { %973 = vst.msk [vmem:[#allocation2] sm:$0xff] %vm972_vm2, %v818_v19 }
 0x13c   : > { %v968_v44 = vpop.f32.mrf.mxu0 }
 0x13d   : > { %v4466_v45 = vadd.f32 %v968_v44, %v901_v43 }
 0x13e   : > { %v3553_v46 = vpop.f32.mrf.mxu0 }
 0x13f   : > { %v894_v25 = vpop.f32.mrf.mxu1  ;;  %975 = vst.msk [vmem:[#allocation4] sm:$0xff] %vm972_vm2, %v4466_v45 }
 0x140   : > { %v895_v26 = vadd.f32 %v894_v25, %v824_v24 }
 0x141   : > { %v3542_v27 = vpop.f32.mrf.mxu1  ;;  %v1024_v29 = vld [vmem:[#allocation2] sm:$0xff] }
 0x142   : > { %974 = vst.msk [vmem:[#allocation3] sm:$0xff] %vm972_vm2, %v895_v26  ;;  %999 = vrot.lane.b32.xlu1 %v895_v26, %s4117_s4  ;;  %983 = vrot.lane.b32.xlu0 %v895_v26, %s4118_s13 }
 0x146   : > { %1014 = vrot.lane.b32.xlu1 %v895_v26, %s4119_s25  ;;  %977 = vrot.lane.b32.xlu0 %v818_v19, %s4118_s13  ;;  %v1032_v47 = vld [vmem:[#allocation4] sm:$0xff] }
 0x149   : > { %v1028_v28 = vld [vmem:[#allocation3] sm:$0xff] }
 0x14a   : > { %1009 = vrot.lane.b32.xlu1 %v818_v19, %s4119_s25  ;;  %994 = vrot.lane.b32.xlu0 %v818_v19, %s4117_s4 }
 0x14b   : > { %3555 = vmatpush3.xpose.msk.msra.mxu1 %vm972_vm2, %v1028_v28 }
 0x14c   : > { %3559 = vmatprep.subr.mxu1 %v4115_v0 }
 0x14e   : > { %3557 = vmatmul.mubr.msk.f32.vlgmr.msra.gmra.mxu1 %vm972_vm2, %v1024_v29 }
 0x14f   : > { %3561 = vmatprep.mubr.msk.f32.mxu1 %vm4116_vm0, %v4115_v0 }
 0x1b4   : > { %v1000_v30 = vpop.permute.xlu1 %999  ;;  %v984_v31 = vpop.permute.xlu0 %983 }
 0x1b5   : > { %1003 = vst.msk [vmem:[#allocation3 + $0x20] sm:$0xff] %vm972_vm2, %v1000_v30  ;;  %987 = vst.msk [vmem:[#allocation3 + $0x10] sm:$0xff] %vm972_vm2, %v984_v31 }
 0x1b8   : > { %v1015_v32 = vpop.permute.xlu1 %1014  ;;  %v978_v33 = vpop.permute.xlu0 %977 }
 0x1b9   : > { %1018 = vst.msk [vmem:[#allocation3 + $0x30] sm:$0xff] %vm972_vm2, %v1015_v32  ;;  %981 = vst.msk [vmem:[#allocation2 + $0x8] sm:$0xff] %vm972_vm2, %v978_v33 }
 0x1bc   : > { %v1010_v34 = vpop.permute.xlu1 %1009  ;;  %v995_v35 = vpop.permute.xlu0 %994  ;;  %v1029_v36 = vld [vmem:[#allocation3 + $0x10] sm:$0xff]  ;;  %v1030_v37 = vld [vmem:[#allocation3 + $0x20] sm:$0xff] }
 0x1bd   : > { %1013 = vst.msk [vmem:[#allocation2 + $0x18] sm:$0xff] %vm972_vm2, %v1010_v34  ;;  %998 = vst.msk [vmem:[#allocation2 + $0x10] sm:$0xff] %vm972_vm2, %v995_v35  ;;  %3560 = vmatpush3.xpose.msk.msra.mxu1 %vm972_vm2, %v1029_v36  ;;  %3565 = vmatpush3.xpose.msk.msra.mxu0 %vm972_vm2, %v1030_v37 }
 0x1be   : > { %3569 = vmatprep.subr.mxu1 %v4115_v0  ;;  %3574 = vmatprep.subr.mxu0 %v4115_v0 }
 0x1c0   : > { %v1025_v38 = vld [vmem:[#allocation2 + $0x8] sm:$0xff]  ;;  %v1031_v39 = vld [vmem:[#allocation3 + $0x30] sm:$0xff] }
 0x1c1   : > { %3562 = vmatmul.mubr.msk.f32.vlgmr.msra.gmra.mxu1 %vm972_vm2, %v1025_v38 }
 0x1c2   : > { %3570 = vmatpush3.xpose.msk.msra.mxu1 %vm972_vm2, %v1031_v39  ;;  %3571 = vmatprep.mubr.msk.f32.mxu1 %vm4116_vm0, %v4115_v0 }
 0x1c3   : > { %3579 = vmatprep.subr.mxu1 %v4115_v0 }
 0x1c4   : > { %v1026_v40 = vld [vmem:[#allocation2 + $0x10] sm:$0xff]  ;;  %v1027_v41 = vld [vmem:[#allocation2 + $0x18] sm:$0xff] }
 0x1c5   : > { %3567 = vmatmul.mubr.msk.f32.vlgmr.msra.gmra.mxu0 %vm972_vm2, %v1026_v40  ;;  %3572 = vmatmul.mubr.msk.f32.vlgmr.msra.gmra.mxu1 %vm972_vm2, %v1027_v41 }
 0x1c6   : > { %3576 = vmatprep.mubr.msk.f32.mxu0 %vm4116_vm0, %v4115_v0  ;;  %3581 = vmatprep.mubr.msk.f32.mxu1 %vm4116_vm0, %v4115_v0 }
 0x1c7   : > { %3575 = vmatpush3.msra.mxu0 %v1032_v47 }
 0x1c8   : > { %3584 = vmatprep.subr.mxu0 %v4115_v0 }
 0x20e   : > { %v1108_v48 = vpop.f32.mrf.mxu1 }
 0x20f   : > { %v1341_v50 = vmul.f32 0.35355338, %v1108_v48 }
 0x210   : > { %v3558_v51 = vpop.f32.mrf.mxu1 }
 0x211   : > { %v1345_v52 = vadd.f32 %v1341_v50, %v705_v49 }
 0x213   : > { %v1349_v53 = vsel %vm972_vm2, %v1345_v52, -inf }
 0x214   : > { %1350 = vmax.xlane.f32.xlu0 %v1349_v53  ;;  %v721_v53 = vld [vmem:[#allocation11 + $0x70] sm:$0xff] }
 0x281   : > { %v1184_v54 = vpop.f32.mrf.mxu1 }
 0x282   : > { %v1342_v55 = vmul.f32 0.35355338, %v1184_v54  ;;  %v720_v54 = vld [vmem:[#allocation11 + $0x68] sm:$0xff] }
 0x283   : > { %v3563_v56 = vpop.f32.mrf.mxu1 }
 0x284   : > { %v1346_v57 = vadd.f32 %v1342_v55, %v705_v49  ;;  %v719_v56 = vld [vmem:[#allocation11 + $0x60] sm:$0xff] }
 0x285   : > { %v1260_v58 = vpop.f32.mrf.mxu0  ;;  %v1336_v59 = vpop.f32.mrf.mxu1 }
 0x286   : > { %v1343_v60 = vmul.f32 0.35355338, %v1260_v58  ;;  %v1344_v61 = vmul.f32 0.35355338, %v1336_v59  ;;  %v1352_v62 = vsel %vm972_vm2, %v1346_v57, -inf }
 0x287   : > { %v3568_v63 = vpop.f32.mrf.mxu0  ;;  %1353 = vmax.xlane.f32.xlu1 %v1352_v62  ;;  %v3573_v1 = vpop.f32.mrf.mxu1 }
 0x288   : > { %v1347_v2 = vadd.f32 %v1343_v60, %v705_v49  ;;  %v1348_v4 = vadd.f32 %v1344_v61, %v705_v49 }
 0x28a   : > { %v1355_v3 = vsel %vm972_vm2, %v1347_v2, -inf  ;;  %v1358_v6 = vsel %vm972_vm2, %v1348_v4, -inf }
 0x28b   : > { %1356 = vmax.xlane.f32.xlu0 %v1355_v3  ;;  %v1707_v3 = vsub.s32 3, %v4403_v12  ;;  %v2924_v12 = vld [vmem:[%s4854_s11 + $0x18] sm:$0xff] }
 0x28f   : > { %1359 = vmax.xlane.f32.xlu0 %v1358_v6 }
 0x298   : > { %989 = vrot.lane.b32.xlu1 %v4466_v45, %s4118_s13 }
 0x29d   : > { %v1351_v7 = vpop.xlane.xlu0 %1350 }
 0x29e   : > { %v1361_v8 = vsub.f32 %v1345_v52, %v1351_v7  ;;  %v722_v52 = vld [vmem:[#allocation11 + $0x78] sm:$0xff] }
 0x2a0   : > { %v1365_v9 = vmul.f32 1.442695, %v1361_v8 }
 0x2a2   : > { %3839 = vpow2.f32 %v1365_v9 }
 0x2af   : > { %v3840_v10 = vpop.eup %3839 }
 0x2b0   : > { %v1373_v11 = vsel %vm972_vm2, %v3840_v10, 0.0 }
 0x2bc   : > { %1374 = vadd.xlane.f32.xlu1 %v1373_v11  ;;  %v731_v11 = vld [vmem:[#allocation12 + $0x38] sm:$0xff] }
 0x310   : > { %v1354_v15 = vpop.xlane.xlu1 %1353 }
 0x311   : > { %v1362_v16 = vsub.f32 %v1346_v57, %v1354_v15 }
 0x313   : > { %v1367_v17 = vmul.f32 1.442695, %v1362_v16 }
 0x314   : > { %v1357_v18 = vpop.xlane.xlu0 %1356  ;;  %v990_v19 = vpop.permute.xlu1 %989 }
 0x315   : > { %3841 = vpow2.f32 %v1367_v17  ;;  %v1363_v21 = vsub.f32 %v1347_v2, %v1357_v18  ;;  %993 = vst.msk [vmem:[#allocation4 + $0x10] sm:$0xff] %vm972_vm2, %v990_v19 }
 0x317   : > { %v1369_v22 = vmul.f32 1.442695, %v1363_v21  ;;  %v729_v21 = vld [vmem:[#allocation12 + $0x28] sm:$0xff] }
 0x318   : > { %v1360_v23 = vpop.xlane.xlu0 %1359 }
 0x319   : > { %3843 = vpow2.f32 %v1369_v22  ;;  %v1364_v24 = vsub.f32 %v1348_v4, %v1360_v23  ;;  %v1708_v4 = vrot.slane %v4411_v14, %v1707_v3  ;;  %v730_v14 = vld [vmem:[#allocation12 + $0x30] sm:$0xff]  ;;  %v703_v22 = vld [vmem:[%s700_s28] sm:$0xff]  ;;  %v704_v23 = vld [vmem:[%s700_s28 + $0x8] sm:$0xff] }
 0x31b   : > { %v1371_v25 = vmul.f32 1.442695, %v1364_v24  ;;  %v727_v24 = vld [vmem:[#allocation12 + $0x18] sm:$0xff] }
 0x31c   : > { %v1033_v26 = vld [vmem:[#allocation4 + $0x10] sm:$0xff] }
 0x31d   : > { %3845 = vpow2.f32 %v1371_v25  ;;  %3580 = vmatpush3.msra.mxu1 %v1033_v26  ;;  %v726_v25 = vld [vmem:[#allocation12 + $0x10] sm:$0xff]  ;;  %v725_v26 = vld [vmem:[#allocation12 + $0x8] sm:$0xff] }
 0x31e   : > { %3589 = vmatprep.subr.mxu1 %v4115_v0 }
 0x322   : > { %v3842_v27 = vpop.eup %3841 }
 0x323   : > { %v1376_v28 = vsel %vm972_vm2, %v3842_v27, 0.0 }
 0x324   : > { %1377 = vadd.xlane.f32.xlu0 %v1376_v28 }
 0x326   : > { %v3844_v29 = vpop.eup %3843 }
 0x327   : > { %v1379_v30 = vsel %vm972_vm2, %v3844_v29, 0.0 }
 0x328   : > { %1380 = vadd.xlane.f32.xlu1 %v1379_v30 }
 0x32a   : > { %v3846_v31 = vpop.eup %3845 }
 0x32b   : > { %v1382_v32 = vsel %vm972_vm2, %v3846_v31, 0.0 }
 0x32c   : > { %1383 = vadd.xlane.f32.xlu0 %v1382_v32  ;;  %v4543_v32 = vld [vmem:[%s4853_s10] sm:$0x7] }
 0x339   : > { %1019 = vrot.lane.b32.xlu1 %v4466_v45, %s4119_s25 }
 0x342   : > { %1004 = vrot.lane.b32.xlu0 %v4466_v45, %s4117_s4 }
 0x345   : > { %v1375_v33 = vpop.xlane.xlu1 %1374 }
 0x346   : > { %3847 = vrcp.f32 %v1375_v33 }
 0x353   : > { %v3848_v34 = vpop.eup %3847 }
 0x354   : > { %v1389_v35 = vmul.f32 %v3848_v34, %v3840_v10 }
 0x356   : > { %3577 = vmatmul.mubr.msk.f32.vlgmr.msra.gmra.mxu0 %vm972_vm2, %v1389_v35 }
 0x357   : > { %3586 = vmatprep.mubr.msk.f32.mxu0 %vm4116_vm0, %v4115_v0 }
 0x3ad   : > { %v1378_v36 = vpop.xlane.xlu0 %1377 }
 0x3ae   : > { %3849 = vrcp.f32 %v1378_v36  ;;  %v1805_v36 = vrot.slane %v4543_v32, %v4406_v13 }
 0x3b1   : > { %v1381_v37 = vpop.xlane.xlu1 %1380 }
 0x3b2   : > { %3851 = vrcp.f32 %v1381_v37 }
 0x3b5   : > { %v1020_v38 = vpop.permute.xlu1 %1019  ;;  %v1384_v39 = vpop.xlane.xlu0 %1383 }
 0x3b6   : > { %1023 = vst.msk [vmem:[#allocation4 + $0x30] sm:$0xff] %vm972_vm2, %v1020_v38  ;;  %3853 = vrcp.f32 %v1384_v39  ;;  %v4557_v39 = vld [vmem:[%s4851_s8] sm:$0xf] }
 0x3b9   : > { %v1005_v40 = vpop.permute.xlu0 %1004 }
 0x3ba   : > { %1008 = vst.msk [vmem:[#allocation4 + $0x20] sm:$0xff] %vm972_vm2, %v1005_v40  ;;  %v1887_v40 = vrot.slane %v4557_v39, %v4417_v20 }
 0x3bb   : > { %v3850_v41 = vpop.eup %3849 }
 0x3bc   : > { %v1390_v43 = vmul.f32 %v3850_v41, %v3842_v27  ;;  %v724_v27 = vld [vmem:[#allocation12] sm:$0xff] }
 0x3bd   : > { %v1035_v44 = vld [vmem:[#allocation4 + $0x30] sm:$0xff] }
 0x3be   : > { %3582 = vmatmul.mubr.msk.f32.vlgmr.msra.gmra.mxu1 %vm972_vm2, %v1390_v43 }
 0x3bf   : > { %v3852_v45 = vpop.eup %3851  ;;  %3590 = vmatpush3.msra.mxu1 %v1035_v44  ;;  %3591 = vmatprep.mubr.msk.f32.mxu1 %vm4116_vm0, %v4115_v0 }
 0x3c0   : > { %v1391_v46 = vmul.f32 %v3852_v45, %v3844_v29  ;;  %3605 = vmatprep.subr.mxu1 %v4115_v0 }
 0x3c1   : > { %v1034_v47 = vld [vmem:[#allocation4 + $0x20] sm:$0xff] }
 0x3c2   : > { %3585 = vmatpush3.msra.mxu0 %v1034_v47 }
 0x3c3   : > { %v3854_v48 = vpop.eup %3853  ;;  %3587 = vmatmul.mubr.msk.f32.vlgmr.msra.gmra.mxu0 %vm972_vm2, %v1391_v46  ;;  %3594 = vmatprep.subr.mxu0 %v4115_v0 }
 0x3c4   : > { %v1392_v49 = vmul.f32 %v3854_v48, %v3846_v31  ;;  %3602 = vmatprep.mubr.msk.f32.mxu0 %vm4116_vm0, %v4115_v0  ;;  %3595 = vmatpush3.msra.mxu0 %v722_v52  ;;  %v4538_v31 = vld [vmem:[%s4852_s9] sm:$0x7] }
 0x3c5   : > { %3596 = vmatprep.subr.mxu0 %v4115_v0  ;;  %v1800_v33 = vrot.slane %v4538_v31, %v4406_v13  ;;  %v735_v48 = vld [vmem:[#allocation12 + $0x58] sm:$0xff] }
 0x3c6   : > { %3592 = vmatmul.mubr.msk.f32.vlgmr.msra.gmra.mxu1 %vm972_vm2, %v1392_v49  ;;  %3597 = vmatpush3.msra.mxu0 %v721_v53  ;;  %v734_v49 = vld [vmem:[#allocation12 + $0x50] sm:$0xff] }
 0x3c7   : > { %3613 = vmatprep.mubr.msk.f32.mxu1 %vm4116_vm0, %v4115_v0  ;;  %3598 = vmatprep.subr.mxu0 %v4115_v0 }
 0x3c8   : > { %3599 = vmatpush3.msra.mxu0 %v720_v54  ;;  %3606 = vmatpush3.msra.mxu1 %v727_v24 }
 0x3c9   : > { %3600 = vmatprep.subr.mxu0 %v4115_v0  ;;  %3607 = vmatprep.subr.mxu1 %v4115_v0 }
 0x3ca   : > { %3601 = vmatpush3.msra.mxu0 %v719_v56  ;;  %3608 = vmatpush3.msra.mxu1 %v726_v25 }
 0x3cb   : > { %3616 = vmatprep.subr.mxu0 %v731_v11  ;;  %3609 = vmatprep.subr.mxu1 %v4115_v0 }
 0x3cc   : > { %3610 = vmatpush3.msra.mxu1 %v725_v26 }
 0x3cd   : > { %3611 = vmatprep.subr.mxu1 %v4115_v0 }
 0x3ce   : > { %3612 = vmatpush3.msra.mxu1 %v724_v27 }
 0x3cf   : > { %3627 = vmatprep.subr.mxu1 %v735_v48 }
 0x416   : > { %v1462_v50 = vpop.f32.mrf.mxu0 }
 0x417   : > { %1685 = vst.msk [vmem:[#allocation5] sm:$0xff] %vm972_vm2, %v1462_v50  ;;  %v733_v50 = vld [vmem:[#allocation12 + $0x48] sm:$0xff] }
 0x418   : > { %v3578_v51 = vpop.f32.mrf.mxu0 }
 0x419   : > { %v732_v51 = vld [vmem:[#allocation12 + $0x40] sm:$0xff] }
 0x47e   : > { %v1535_v55 = vpop.f32.mrf.mxu1 }
 0x47f   : > { %1687 = vrot.lane.b32.xlu1 %v1535_v55, %s4120_s21 }
 0x480   : > { %v3583_v57 = vpop.f32.mrf.mxu1 }
 0x483   : > { %v1608_v58 = vpop.f32.mrf.mxu0 }
 0x484   : > { %1693 = vrot.lane.b32.xlu0 %v1608_v58, %s4121_s27 }
 0x485   : > { %v3588_v59 = vpop.f32.mrf.mxu0 }
 0x486   : > { %v1681_v60 = vpop.f32.mrf.mxu1  ;;  %v1810_v59 = vrot.slane %v4557_v39, %v4406_v13  ;;  %v1972_v13 = vrot.slane %v4557_v39, %v4462_v42 }
 0x487   : > { %1699 = vrot.lane.b32.xlu1 %v1681_v60, %s4122_s16 }
 0x488   : > { %v3593_v61 = vpop.f32.mrf.mxu1 }
 0x4f1   : > { %v1688_v62 = vpop.permute.xlu1 %1687 }
 0x4f2   : > { %1691 = vst.msk [vmem:[#allocation5] sm:$0xff] %vm1690_vm3, %v1688_v62 }
 0x4f6   : > { %v1694_v63 = vpop.permute.xlu0 %1693 }
 0x4f7   : > { %1697 = vst.msk [vmem:[#allocation5] sm:$0xff] %vm1696_vm4, %v1694_v63 }
 0x4f9   : > { %v1700_v1 = vpop.permute.xlu1 %1699 }
 0x4fa   : > { %1703 = vst.msk [vmem:[#allocation5] sm:$0xff] %vm1702_vm5, %v1700_v1 }
 0x501   : > { %v1704_v2 = vld [vmem:[#allocation5] sm:$0xff] }
 0x502   : > { %3603 = vmatmul.mubr.msk.f32.vlgmr.msra.gmra.mxu0 %vm747_vm1, %v1704_v2 }
 0x503   : > { %3617 = vmatpush3.msra.mxu0 %v731_v11  ;;  %3624 = vmatprep.mubr.msk.f32.mxu0 %vm747_vm1, %v703_v22 }
 0x504   : > { %3618 = vmatprep.subr.mxu0 %v730_v14 }
 0x505   : > { %3619 = vmatpush3.msra.mxu0 %v730_v14 }
 0x506   : > { %3620 = vmatprep.subr.mxu0 %v729_v21 }
 0x507   : > { %3621 = vmatpush3.msra.mxu0 %v729_v21 }
 0x5c2   : > { %v1778_v6 = vpop.f32.mrf.mxu0 }
 0x5c3   : > { %v1779_v7 = vadd.f32 %v1778_v6, %v1708_v4 }
 0x5c4   : > { %v3604_v8 = vpop.f32.mrf.mxu0 }
 0x5c5   : > { %v1782_v9 = vadd.f32 %v1779_v7, %v4385_v5  ;;  %v728_v5 = vld [vmem:[#allocation12 + $0x20] sm:$0xff] }
 0x5c6   : > { %3622 = vmatprep.subr.mxu0 %v728_v5 }
 0x5c7   : > { %v1783_v10 = vsel %vm747_vm1, %v1782_v9, 0.0  ;;  %3623 = vmatpush3.msra.mxu0 %v728_v5 }
 0x5c8   : > { %1784 = vadd.xlane.f32.xlu0 %v1783_v10  ;;  %3625 = vmatmul.mubr.msk.f32.vlgmr.msra.gmra.mxu0 %vm747_vm1, %v704_v23 }
 0x5c9   : > { %3638 = vmatprep.subr.mxu0 %v4115_v0  ;;  %3642 = vmatprep.mubr.msk.f32.mxu0 %vm4116_vm0, %v4115_v0 }
 0x651   : > { %v1785_v15 = vpop.xlane.xlu0 %1784 }
 0x652   : > { %v1787_v16 = vmul.f32 0.03125, %v1785_v15 }
 0x654   : > { %v1788_v17 = vsub.f32 %v1782_v9, %v1787_v16 }
 0x656   : > { %v1789_v18 = vmul.f32 %v1788_v17, %v1788_v17 }
 0x658   : > { %v1790_v19 = vsel %vm747_vm1, %v1789_v18, 0.0 }
 0x659   : > { %1791 = vadd.xlane.f32.xlu1 %v1790_v19 }
 0x688   : > { %v3626_v41 = vpop.f32.mrf.mxu0 }
 0x689   : > { %v1966_v43 = vadd.f32 %v3626_v41, %v1887_v40 }
 0x68a   : > { %v1960_v44 = vpop.f32.mrf.mxu0 }
 0x68b   : > { %2050 = vst.msk [vmem:[#allocation3 + $0x8] sm:$0xff] %vm972_vm2, %v1966_v43  ;;  %2062 = vrot.lane.b32.xlu0 %v1966_v43, %s4118_s13  ;;  %v1961_v45 = vadd.f32 %v1960_v44, %v1887_v40 }
 0x68d   : > { %2049 = vst.msk [vmem:[#allocation3] sm:$0xff] %vm972_vm2, %v1961_v45  ;;  %2060 = vrot.lane.b32.xlu1 %v1961_v45, %s4118_s13 }
 0x68f   : > { %2084 = vrot.lane.b32.xlu0 %v1966_v43, %s4117_s4 }
 0x692   : > { %v2123_v46 = vld [vmem:[#allocation3 + $0x8] sm:$0xff] }
 0x693   : > { %2104 = vrot.lane.b32.xlu0 %v1966_v43, %s4119_s25  ;;  %3639 = vmatpush3.xpose.msk.msra.mxu0 %vm972_vm2, %v2123_v46 }
 0x694   : > { %3640 = vmatprep.subr.mxu0 %v4115_v0  ;;  %v2122_v47 = vld [vmem:[#allocation3] sm:$0xff] }
 0x697   : > { %2102 = vrot.lane.b32.xlu0 %v1961_v45, %s4119_s25  ;;  %3641 = vmatpush3.xpose.msk.msra.mxu0 %vm972_vm2, %v2122_v47 }
 0x698   : > { %3652 = vmatprep.subr.mxu0 %v4115_v0 }
 0x6e2   : > { %v1792_v28 = vpop.xlane.xlu1 %1791 }
 0x6e3   : > { %v1793_v29 = vmul.f32 0.03125, %v1792_v28 }
 0x6e5   : > { %v1794_v30 = vadd.f32 1e-05, %v1793_v29 }
 0x6e7   : > { %3855 = vrsqrt.f32 %v1794_v30 }
 0x6f4   : > { %v3856_v34 = vpop.eup %3855 }
 0x6f5   : > { %v1796_v35 = vmul.f32 %v3856_v34, %v1788_v17 }
 0x6f7   : > { %v1801_v37 = vmul.f32 %v1800_v33, %v1796_v35 }
 0x6f9   : > { %v4549_v38 = vadd.f32 %v1805_v36, %v1801_v37 }
 0x6fb   : > { %3614 = vmatmul.mubr.msk.f32.vlgmr.msra.gmra.mxu1 %vm747_vm1, %v4549_v38 }
 0x6fc   : > { %3635 = vmatprep.mubr.msk.f32.mxu1 %vm747_vm1, %v703_v22  ;;  %3628 = vmatpush3.msra.mxu1 %v735_v48 }
 0x6fd   : > { %3629 = vmatprep.subr.mxu1 %v734_v49  ;;  %v2063_v52 = vpop.permute.xlu0 %2062 }
 0x6fe   : > { %3630 = vmatpush3.msra.mxu1 %v734_v49  ;;  %2067 = vst.msk [vmem:[#allocation3 + $0x18] sm:$0xff] %vm972_vm2, %v2063_v52 }
 0x6ff   : > { %3631 = vmatprep.subr.mxu1 %v733_v50  ;;  %v2061_v53 = vpop.permute.xlu1 %2060 }
 0x700   : > { %3632 = vmatpush3.msra.mxu1 %v733_v50  ;;  %2066 = vst.msk [vmem:[#allocation3 + $0x10] sm:$0xff] %vm972_vm2, %v2061_v53 }
 0x701   : > { %3633 = vmatprep.subr.mxu1 %v732_v51  ;;  %v2085_v54 = vpop.permute.xlu0 %2084 }
 0x702   : > { %3634 = vmatpush3.msra.mxu1 %v732_v51  ;;  %2089 = vst.msk [vmem:[#allocation3 + $0x28] sm:$0xff] %vm972_vm2, %v2085_v54 }
 0x703   : > { %3645 = vmatprep.subr.mxu1 %v4115_v0  ;;  %3636 = vmatmul.mubr.msk.f32.vlgmr.msra.gmra.mxu1 %vm747_vm1, %v704_v23  ;;  %v706_v23 = vld [vmem:[%s602_s0] sm:$0xff]  ;;  %s3369_s0 = sshll.u32 %s4344_s5, 5 }
 0x704   : > { %3649 = vmatprep.mubr.msk.f32.mxu1 %vm4116_vm0, %v4115_v0 }
 0x705   : > { %v2105_v55 = vpop.permute.xlu0 %2104  ;;  %v2125_v56 = vld [vmem:[#allocation3 + $0x18] sm:$0xff] }
 0x706   : > { %2109 = vst.msk [vmem:[#allocation3 + $0x38] sm:$0xff] %vm972_vm2, %v2105_v55  ;;  %3646 = vmatpush3.xpose.msk.msra.mxu1 %vm972_vm2, %v2125_v56 }
 0x707   : > { %3647 = vmatprep.subr.mxu1 %v4115_v0  ;;  %v2124_v58 = vld [vmem:[#allocation3 + $0x10] sm:$0xff] }
 0x709   : > { %v2103_v57 = vpop.permute.xlu0 %2102  ;;  %v2127_v63 = vld [vmem:[#allocation3 + $0x28] sm:$0xff] }
 0x70a   : > { %2108 = vst.msk [vmem:[#allocation3 + $0x30] sm:$0xff] %vm972_vm2, %v2103_v57  ;;  %3648 = vmatpush3.xpose.msk.msra.mxu1 %vm972_vm2, %v2124_v58 }
 0x70b   : > { %3659 = vmatprep.subr.mxu1 %v4115_v0 }
 0x70d   : > { %v2129_v16 = vld [vmem:[#allocation3 + $0x38] sm:$0xff] }
 0x711   : > { %v2128_v18 = vld [vmem:[#allocation3 + $0x30] sm:$0xff] }
 0x7bb   : > { %v1880_v60 = vpop.f32.mrf.mxu1 }
 0x7bc   : > { %v1881_v61 = vadd.f32 %v1880_v60, %v1810_v59 }
 0x7bd   : > { %v3615_v62 = vpop.f32.mrf.mxu1 }
 0x7be   : > { %2048 = vst.msk [vmem:[#allocation2] sm:$0xff] %vm972_vm2, %v1881_v61  ;;  %2098 = vrot.lane.b32.xlu0 %v1881_v61, %s4119_s25  ;;  %2054 = vrot.lane.b32.xlu1 %v1881_v61, %s4118_s13 }
 0x7c2   : > { %2082 = vrot.lane.b32.xlu1 %v1961_v45, %s4117_s4 }
 0x7c3   : > { %v3637_v2 = vpop.f32.mrf.mxu1 }
 0x7c4   : > { %v4599_v4 = vadd.f32 %v3637_v2, %v1972_v13 }
 0x7c5   : > { %v2118_v1 = vld [vmem:[#allocation2] sm:$0xff]  ;;  %v2039_v6 = vpop.f32.mrf.mxu1 }
 0x7c6   : > { %2078 = vrot.lane.b32.xlu1 %v1881_v61, %s4117_s4  ;;  %3643 = vmatmul.mubr.msk.f32.vlgmr.msra.gmra.mxu0 %vm972_vm2, %v2118_v1  ;;  %2052 = vst.msk [vmem:[#allocation4 + $0x8] sm:$0xff] %vm972_vm2, %v4599_v4  ;;  %v4603_v7 = vadd.f32 %v2039_v6, %v1972_v13 }
 0x7c7   : > { %3653 = vmatpush3.xpose.msk.msra.mxu0 %vm972_vm2, %v2127_v63  ;;  %3656 = vmatprep.mubr.msk.f32.mxu0 %vm4116_vm0, %v4115_v0 }
 0x7c8   : > { %3654 = vmatprep.subr.mxu0 %v4115_v0  ;;  %2051 = vst.msk [vmem:[#allocation4] sm:$0xff] %vm972_vm2, %v4603_v7 }
 0x7cd   : > { %v2131_v21 = vld [vmem:[#allocation4 + $0x8] sm:$0xff] }
 0x7cf   : > { %v2130_v5 = vld [vmem:[#allocation4] sm:$0xff] }
 0x830   : > { %v2099_v8 = vpop.permute.xlu0 %2098  ;;  %v2055_v9 = vpop.permute.xlu1 %2054 }
 0x831   : > { %2101 = vst.msk [vmem:[#allocation2 + $0x18] sm:$0xff] %vm972_vm2, %v2099_v8  ;;  %2057 = vst.msk [vmem:[#allocation2 + $0x8] sm:$0xff] %vm972_vm2, %v2055_v9 }
 0x834   : > { %v2083_v10 = vpop.permute.xlu1 %2082 }
 0x835   : > { %2088 = vst.msk [vmem:[#allocation3 + $0x20] sm:$0xff] %vm972_vm2, %v2083_v10 }
 0x838   : > { %v2079_v11 = vpop.permute.xlu1 %2078  ;;  %v2119_v15 = vld [vmem:[#allocation2 + $0x8] sm:$0xff]  ;;  %v2121_v19 = vld [vmem:[#allocation2 + $0x18] sm:$0xff] }
 0x839   : > { %2081 = vst.msk [vmem:[#allocation2 + $0x10] sm:$0xff] %vm972_vm2, %v2079_v11  ;;  %3650 = vmatmul.mubr.msk.f32.vlgmr.msra.gmra.mxu1 %vm972_vm2, %v2119_v15 }
 0x83a   : > { %3660 = vmatpush3.xpose.msk.msra.mxu1 %vm972_vm2, %v2129_v16  ;;  %3663 = vmatprep.mubr.msk.f32.mxu1 %vm4116_vm0, %v4115_v0 }
 0x83b   : > { %3661 = vmatprep.subr.mxu1 %v4115_v0 }
 0x83c   : > { %v2126_v17 = vld [vmem:[#allocation3 + $0x20] sm:$0xff] }
 0x83d   : > { %3655 = vmatpush3.xpose.msk.msra.mxu0 %vm972_vm2, %v2126_v17 }
 0x83e   : > { %3662 = vmatpush3.xpose.msk.msra.mxu1 %vm972_vm2, %v2128_v18  ;;  %3666 = vmatprep.subr.mxu0 %v4115_v0 }
 0x83f   : > { %3673 = vmatprep.subr.mxu1 %v4115_v0 }
 0x840   : > { %v2120_v14 = vld [vmem:[#allocation2 + $0x10] sm:$0xff] }
 0x841   : > { %3664 = vmatmul.mubr.msk.f32.vlgmr.msra.gmra.mxu1 %vm972_vm2, %v2121_v19  ;;  %3657 = vmatmul.mubr.msk.f32.vlgmr.msra.gmra.mxu0 %vm972_vm2, %v2120_v14 }
 0x842   : > { %3670 = vmatprep.mubr.msk.f32.mxu0 %vm4116_vm0, %v4115_v0  ;;  %3677 = vmatprep.mubr.msk.f32.mxu1 %vm4116_vm0, %v4115_v0 }
 0x843   : > { %3667 = vmatpush3.msra.mxu0 %v2131_v21 }
 0x844   : > { %3668 = vmatprep.subr.mxu0 %v4115_v0 }
 0x845   : > { %3669 = vmatpush3.msra.mxu0 %v2130_v5 }
 0x846   : > { %3680 = vmatprep.subr.mxu0 %v4115_v0 }
 0x886   : > { %v2213_v22 = vpop.f32.mrf.mxu0 }
 0x887   : > { %v2454_v24 = vmul.f32 0.35355338, %v2213_v22 }
 0x888   : > { %v3644_v25 = vpop.f32.mrf.mxu0 }
 0x889   : > { %v2458_v26 = vadd.f32 %v2454_v24, %v706_v23 }
 0x88b   : > { %v2463_v27 = vsel %vm2462_vm6, %v2458_v26, -inf }
 0x88c   : > { %2464 = vmax.xlane.f32.xlu1 %v2463_v27 }
 0x8f9   : > { %v2292_v28 = vpop.f32.mrf.mxu1 }
 0x8fa   : > { %v2455_v29 = vmul.f32 0.35355338, %v2292_v28 }
 0x8fb   : > { %v3651_v30 = vpop.f32.mrf.mxu1 }
 0x8fc   : > { %v2459_v33 = vadd.f32 %v2455_v29, %v706_v23 }
 0x8fe   : > { %v2466_v34 = vsel %vm2462_vm6, %v2459_v33, -inf }
 0x8ff   : > { %2467 = vmax.xlane.f32.xlu0 %v2466_v34 }
 0x901   : > { %v2450_v35 = vpop.f32.mrf.mxu1  ;;  %v2371_v36 = vpop.f32.mrf.mxu0 }
 0x902   : > { %v2457_v37 = vmul.f32 0.35355338, %v2450_v35  ;;  %v2456_v40 = vmul.f32 0.35355338, %v2371_v36  ;;  %v739_v36 = vld [vmem:[#allocation12 + $0x78] sm:$0xff] }
 0x903   : > { %v3665_v41 = vpop.f32.mrf.mxu1  ;;  %v3658_v43 = vpop.f32.mrf.mxu0 }
 0x904   : > { %v2461_v44 = vadd.f32 %v2457_v37, %v706_v23  ;;  %v2460_v45 = vadd.f32 %v2456_v40, %v706_v23  ;;  %v738_v37 = vld [vmem:[#allocation12 + $0x70] sm:$0xff]  ;;  %v737_v41 = vld [vmem:[#allocation12 + $0x68] sm:$0xff] }
 0x906   : > { %v2472_v46 = vsel %vm2462_vm6, %v2461_v44, -inf  ;;  %v2469_v47 = vsel %vm2462_vm6, %v2460_v45, -inf }
 0x907   : > { %2473 = vmax.xlane.f32.xlu1 %v2472_v46  ;;  %2470 = vmax.xlane.f32.xlu0 %v2469_v47 }
 0x915   : > { %v2465_v48 = vpop.xlane.xlu1 %2464 }
 0x916   : > { %v2475_v49 = vsub.f32 %v2458_v26, %v2465_v48 }
 0x918   : > { %2070 = vrot.lane.b32.xlu1 %v4603_v7, %s4118_s13  ;;  %v2479_v50 = vmul.f32 1.442695, %v2475_v49 }
 0x91a   : > { %3857 = vpow2.f32 %v2479_v50 }
 0x91c   : > { %2092 = vrot.lane.b32.xlu1 %v4599_v4, %s4117_s4 }
 0x91d   : > { %2072 = vrot.lane.b32.xlu0 %v4599_v4, %s4118_s13  ;;  %s4658_s13 = scalar_lea.vmem [#allocation15], %s3369_s0  ;;  %s4123_s0 = smov [#allocation15]  }
 0x91e   : > { %s3154_s19 = sshll.u32 %s4658_s13, 4  ;;  %s4771_s19 = int_to_ptr.vmem [resolvable:$true] %s3154_s19 }
 0x91f   : > { %s3985_s30 = scalar_lea.vmem %s4771_s19, 512 }
 0x920   : > { %p3986_p4 = scmp.ne.s32.totalorder %s4771_s19, %s3985_s30 }
 0x921   : > { %2112 = vrot.lane.b32.xlu0 %v4599_v4, %s4119_s25 }
 0x922   : > { %p3987_p7 = pnand %p3986_p4, %p4302_p9 }
 0x924   : > { %p3988_p13 = pneg %p3987_p7 }
 0x927   : > { %v3858_v51 = vpop.eup %3857 }
 0x928   : > { %v2487_v52 = vsel %vm2462_vm6, %v3858_v51, 0.0 }
 0x940   : > { %2488 = vadd.xlane.f32.xlu0 %v2487_v52 }
 0x988   : > { %v2468_v53 = vpop.xlane.xlu0 %2467 }
 0x989   : > { %v2476_v54 = vsub.f32 %v2459_v33, %v2468_v53  ;;  %v2819_v53 = vrot.slane %v4557_v39, %v1707_v3  ;;  %v2923_v3 = vld [vmem:[%s4854_s11 + $0x10] sm:$0xff]  ;;  %v2921_v39 = vld [vmem:[%s4854_s11] sm:$0xff] }
 0x98b   : > { %v2481_v55 = vmul.f32 1.442695, %v2476_v54 }
 0x98d   : > { %3859 = vpow2.f32 %v2481_v55 }
 0x990   : > { %v2474_v56 = vpop.xlane.xlu1 %2473  ;;  %v2471_v57 = vpop.xlane.xlu0 %2470 }
 0x991   : > { %v2478_v58 = vsub.f32 %v2461_v44, %v2474_v56  ;;  %v2477_v59 = vsub.f32 %v2460_v45, %v2471_v57  ;;  %v736_v44 = vld [vmem:[#allocation12 + $0x60] sm:$0xff] }
 0x993   : > { %v2485_v60 = vmul.f32 1.442695, %v2478_v58  ;;  %v2483_v61 = vmul.f32 1.442695, %v2477_v59 }
 0x994   : > { %v2071_v62 = vpop.permute.xlu1 %2070  ;;  %v2073_v63 = vpop.permute.xlu0 %2072 }
 0x995   : > { %3861 = vpow2.f32 %v2485_v60  ;;  %2076 = vst.msk [vmem:[#allocation4 + $0x10] sm:$0xff] %vm972_vm2, %v2071_v62  ;;  %2077 = vst.msk [vmem:[#allocation4 + $0x18] sm:$0xff] %vm972_vm2, %v2073_v63 }
 0x996   : > { %3863 = vpow2.f32 %v2483_v61 }
 0x998   : > { %v2093_v1 = vpop.permute.xlu1 %2092  ;;  %v2113_v13 = vpop.permute.xlu0 %2112 }
 0x999   : > { %2097 = vst.msk [vmem:[#allocation4 + $0x28] sm:$0xff] %vm972_vm2, %v2093_v1  ;;  %2117 = vst.msk [vmem:[#allocation4 + $0x38] sm:$0xff] %vm972_vm2, %v2113_v13  ;;  %v3013_v1 = vld [vmem:[%s4898_s20 + $0x38] sm:$0xff]  ;;  %v3012_v13 = vld [vmem:[%s4898_s20 + $0x30] sm:$0xff] }
 0x99a   : > { %v3860_v2 = vpop.eup %3859 }
 0x99b   : > { %v2490_v4 = vsel %vm2462_vm6, %v3860_v2, 0.0 }
 0x99c   : > { %2491 = vadd.xlane.f32.xlu1 %v2490_v4  ;;  %v2133_v6 = vld [vmem:[#allocation4 + $0x18] sm:$0xff]  ;;  %v2132_v8 = vld [vmem:[#allocation4 + $0x10] sm:$0xff]  ;;  %v3010_v4 = vld [vmem:[%s4898_s20 + $0x20] sm:$0xff] }
 0x99d   : > { %3674 = vmatpush3.msra.mxu1 %v2133_v6  ;;  %v3009_v6 = vld [vmem:[%s4898_s20 + $0x18] sm:$0xff] }
 0x99e   : > { %3675 = vmatprep.subr.mxu1 %v4115_v0 }
 0x99f   : > { %3676 = vmatpush3.msra.mxu1 %v2132_v8 }
 0x9a0   : > { %3687 = vmatprep.subr.mxu1 %v4115_v0  ;;  %v2135_v19 = vld [vmem:[#allocation4 + $0x28] sm:$0xff]  ;;  %v2137_v25 = vld [vmem:[#allocation4 + $0x38] sm:$0xff] }
 0x9a2   : > { %v3862_v9 = vpop.eup %3861 }
 0x9a3   : > { %v3864_v10 = vpop.eup %3863  ;;  %v2496_v11 = vsel %vm2462_vm6, %v3862_v9, 0.0 }
 0x9a4   : > { %2497 = vadd.xlane.f32.xlu1 %v2496_v11  ;;  %v2493_v15 = vsel %vm2462_vm6, %v3864_v10, 0.0  ;;  %v2914_v11 = vrot.slane %v4538_v31, %v4417_v20 }
 0x9a5   : > { %2494 = vadd.xlane.f32.xlu0 %v2493_v15 }
 0x9b5   : > { %2090 = vrot.lane.b32.xlu1 %v4603_v7, %s4117_s4  ;;  %s4899_s4 = sld [smem:[#allocation32_spill]] }
 0x9bb   : > { %2110 = vrot.lane.b32.xlu0 %v4603_v7, %s4119_s25 }
 0x9c9   : > { %v2489_v16 = vpop.xlane.xlu0 %2488 }
 0x9ca   : > { %3865 = vrcp.f32 %v2489_v16 }
 0x9d7   : > { %v3866_v17 = vpop.eup %3865 }
 0x9d8   : > { %v2503_v18 = vmul.f32 %v3866_v17, %v3858_v51  ;;  %v2919_v17 = vrot.slane %v4543_v32, %v4417_v20  ;;  %v3006_v20 = vld [vmem:[%s4898_s20] sm:$0xff] }
 0x9da   : > { %3671 = vmatmul.mubr.msk.f32.vlgmr.msra.gmra.mxu0 %vm2462_vm6, %v2503_v18  ;;  %2893 = vst.msk [vmem:[%s4658_s13] sm:$0xff] %vm2462_vm6, %v2503_v18 }
 0x9db   : > { %3681 = vmatpush3.msra.mxu0 %v2135_v19  ;;  %3684 = vmatprep.mubr.msk.f32.mxu0 %vm4116_vm0, %v4115_v0 }
 0x9dc   : > { %3682 = vmatprep.subr.mxu0 %v4115_v0 }
 0xa25   : > { %v2492_v7 = vpop.xlane.xlu1 %2491 }
 0xa26   : > { %3867 = vrcp.f32 %v2492_v7  ;;  %v3008_v7 = vld [vmem:[%s4898_s20 + $0x10] sm:$0xff] }
 0xa2d   : > { %v2498_v14 = vpop.xlane.xlu1 %2497 }
 0xa2e   : > { %3869 = vrcp.f32 %v2498_v14  ;;  %v2495_v21 = vpop.xlane.xlu0 %2494  ;;  %v3007_v14 = vld [vmem:[%s4898_s20 + $0x8] sm:$0xff] }
 0xa2f   : > { %3871 = vrcp.f32 %v2495_v21  ;;  %v3412_v21 = vld [vmem:[%s4899_s4] ss:$0 sm:$0xff]  ;;  %s3989_s4 = sshll.u32 %s4123_s0, 4  ;;  %s3990_s4 = int_to_ptr.vmem [resolvable:$false] %s3989_s4 }
 0xa30   : > { %p3992_p5 = scmp.lt.s32.totalorder %s4771_s19, %s3990_s4 }
 0xa31   : > { %v2091_v5 = vpop.permute.xlu1 %2090 }
 0xa32   : > { %2096 = vst.msk [vmem:[#allocation4 + $0x20] sm:$0xff] %vm972_vm2, %v2091_v5  ;;  %v2111_v22 = vpop.permute.xlu0 %2110 }
 0xa33   : > { %v3868_v23 = vpop.eup %3867  ;;  %2116 = vst.msk [vmem:[#allocation4 + $0x30] sm:$0xff] %vm972_vm2, %v2111_v22 }
 0xa34   : > { %v2504_v24 = vmul.f32 %v3868_v23, %v3860_v2  ;;  %v3011_v2 = vld [vmem:[%s4898_s20 + $0x28] sm:$0xff] }
 0xa36   : > { %3678 = vmatmul.mubr.msk.f32.vlgmr.msra.gmra.mxu1 %vm2462_vm6, %v2504_v24  ;;  %2894 = vst.msk [vmem:[%s4658_s13 + $0x8] sm:$0xff] %vm2462_vm6, %v2504_v24 }
 0xa37   : > { %3688 = vmatpush3.msra.mxu1 %v2137_v25  ;;  %3691 = vmatprep.mubr.msk.f32.mxu1 %vm4116_vm0, %v4115_v0 }
 0xa38   : > { %3689 = vmatprep.subr.mxu1 %v4115_v0 }
 0xa39   : > { %v2134_v26 = vld [vmem:[#allocation4 + $0x20] sm:$0xff] }
 0xa3a   : > { %3683 = vmatpush3.msra.mxu0 %v2134_v26  ;;  %v2136_v27 = vld [vmem:[#allocation4 + $0x30] sm:$0xff] }
 0xa3b   : > { %v3870_v28 = vpop.eup %3869  ;;  %3690 = vmatpush3.msra.mxu1 %v2136_v27  ;;  %3694 = vmatprep.subr.mxu0 %v4115_v0 }
 0xa3c   : > { %v3872_v29 = vpop.eup %3871  ;;  %v2506_v30 = vmul.f32 %v3870_v28, %v3862_v9  ;;  %3705 = vmatprep.subr.mxu1 %v4115_v0 }
 0xa3d   : > { %v2505_v33 = vmul.f32 %v3872_v29, %v3864_v10 }
 0xa3e   : > { %3692 = vmatmul.mubr.msk.f32.vlgmr.msra.gmra.mxu1 %vm2462_vm6, %v2506_v30  ;;  %2896 = vst.msk [vmem:[%s4658_s13 + $0x18] sm:$0xff] %vm2462_vm6, %v2506_v30 }
 0xa3f   : > { %3685 = vmatmul.mubr.msk.f32.vlgmr.msra.gmra.mxu0 %vm2462_vm6, %v2505_v33  ;;  %2895 = vst.msk [vmem:[%s4658_s13 + $0x10] sm:$0xff] %vm2462_vm6, %v2505_v33  ;;  %3713 = vmatprep.mubr.msk.f32.mxu1 %vm4116_vm0, %v4115_v0  ;;  %s3991_s13 = scalar_lea.vmem %s3990_s4, 1024 }
 0xa40   : > { %3702 = vmatprep.mubr.msk.f32.mxu0 %vm4116_vm0, %v4115_v0  ;;  %3695 = vmatpush3.msra.mxu0 %v739_v36  ;;  %p3993_p10 = scmp.lt.s32.totalorder %s3991_s13, %s3985_s30 }
 0xa41   : > { %3696 = vmatprep.subr.mxu0 %v4115_v0  ;;  %3706 = vmatpush3.msra.mxu1 %v2924_v12 }
 0xa42   : > { %3697 = vmatpush3.msra.mxu0 %v738_v37  ;;  %3707 = vmatprep.subr.mxu1 %v4115_v0  ;;  %p3994_p1 = por %p3993_p10, %p3992_p5 }
 0xa43   : > { %3698 = vmatprep.subr.mxu0 %v4115_v0  ;;  %3708 = vmatpush3.msra.mxu1 %v2923_v3 }
 0xa44   : > { %3699 = vmatpush3.msra.mxu0 %v737_v41  ;;  %3709 = vmatprep.subr.mxu1 %v4115_v0  ;;  %p3995_p2 = pnand %p3994_p1, %p3988_p13 }
 0xa45   : > { %3700 = vmatprep.subr.mxu0 %v4115_v0 }
 0xa46   : > { %3701 = vmatpush3.msra.mxu0 %v736_v44 }
 0xa47   : > { %3716 = vmatprep.subr.mxu0 %v4115_v0 }
 0xa9a   : > { %v2576_v34 = vpop.f32.mrf.mxu0 }
 0xa9b   : > { %2799 = vst.msk [vmem:[#allocation5] sm:$0xff] %vm972_vm2, %v2576_v34 }
 0xa9c   : > { %v3672_v35 = vpop.f32.mrf.mxu0 }
 0xaf6   : > { %v2649_v40 = vpop.f32.mrf.mxu1 }
 0xaf7   : > { %2801 = vrot.lane.b32.xlu1 %v2649_v40, %s4120_s21 }
 0xaf8   : > { %v3679_v43 = vpop.f32.mrf.mxu1 }
 0xafe   : > { %v2795_v45 = vpop.f32.mrf.mxu1 }
 0xaff   : > { %2811 = vrot.lane.b32.xlu1 %v2795_v45, %s4122_s16  ;;  %v2722_v46 = vpop.f32.mrf.mxu0  ;;  %s4900_s16 = sld [smem:[#allocation34_spill]] }
 0xb00   : > { %v3693_v47 = vpop.f32.mrf.mxu1  ;;  %2806 = vrot.lane.b32.xlu0 %v2722_v46, %s4121_s27 }
 0xb01   : > { %v3686_v48 = vpop.f32.mrf.mxu0 }
 0xb69   : > { %v2802_v49 = vpop.permute.xlu1 %2801 }
 0xb6a   : > { %2804 = vst.msk [vmem:[#allocation5] sm:$0xff] %vm1690_vm3, %v2802_v49 }
 0xb71   : > { %v2812_v51 = vpop.permute.xlu1 %2811 }
 0xb72   : > { %v2807_v50 = vpop.permute.xlu0 %2806 }
 0xb73   : > { %2809 = vst.msk [vmem:[#allocation5] sm:$0xff] %vm1696_vm4, %v2807_v50 }
 0xb74   : > { %2814 = vst.msk [vmem:[#allocation5] sm:$0xff] %vm1702_vm5, %v2812_v51 }
 0xb7b   : > { %v2815_v52 = vld [vmem:[#allocation5] sm:$0xff] }
 0xb7c   : > { %3703 = vmatmul.mubr.msk.f32.vlgmr.msra.gmra.mxu0 %vm747_vm1, %v2815_v52 }
 0xb7d   : > { %3732 = vmatprep.mubr.msk.f32.mxu0 %vm4116_vm0, %v4115_v0  ;;  %3717 = vmatpush3.msra.mxu0 %v3013_v1 }
 0xb7e   : > { %3718 = vmatprep.subr.mxu0 %v4115_v0 }
 0xb7f   : > { %3719 = vmatpush3.msra.mxu0 %v3012_v13 }
 0xb80   : > { %3720 = vmatprep.subr.mxu0 %v4115_v0 }
 0xb81   : > { %3721 = vmatpush3.msra.mxu0 %v3011_v2 }
 0xb82   : > { %3722 = vmatprep.subr.mxu0 %v4115_v0 }
 0xb83   : > { %3723 = vmatpush3.msra.mxu0 %v3010_v4 }
 0xb84   : > { %3724 = vmatprep.subr.mxu0 %v4115_v0 }
 0xb85   : > { %3725 = vmatpush3.msra.mxu0 %v3009_v6 }
 0xb86   : > { %3726 = vmatprep.subr.mxu0 %v4115_v0 }
 0xb87   : > { %3727 = vmatpush3.msra.mxu0 %v3008_v7 }
 0xb88   : > { %3728 = vmatprep.subr.mxu0 %v4115_v0 }
 0xb89   : > { %3729 = vmatpush3.msra.mxu0 %v3007_v14 }
 0xb8a   : > { %3730 = vmatprep.subr.mxu0 %v4115_v0 }
 0xb8b   : > { %3731 = vmatpush3.msra.mxu0 %v3006_v20 }
 0xc3c   : > { %v2889_v54 = vpop.f32.mrf.mxu0 }
 0xc3d   : > { %v2890_v55 = vadd.f32 %v2889_v54, %v2819_v53 }
 0xc3e   : > { %v3704_v56 = vpop.f32.mrf.mxu0 }
 0xc3f   : > { %v2897_v57 = vadd.f32 %v2890_v55, %v4549_v38  ;;  %v2922_v38 = vld [vmem:[%s4854_s11 + $0x8] sm:$0xff] }
 0xc40   : > { %3710 = vmatpush3.msra.mxu1 %v2922_v38 }
 0xc41   : > { %v2898_v58 = vsel %vm747_vm1, %v2897_v57, 0.0  ;;  %3711 = vmatprep.subr.mxu1 %v4115_v0  ;;  %v3414_v0 = vld [vmem:[%s4900_s16] ss:$0 sm:$0xff] }
 0xc42   : > { %2899 = vadd.xlane.f32.xlu0 %v2898_v58  ;;  %3712 = vmatpush3.msra.mxu1 %v2921_v39 }
 0xccb   : > { %v2900_v59 = vpop.xlane.xlu0 %2899 }
 0xccc   : > { %v2901_v60 = vmul.f32 0.03125, %v2900_v59 }
 0xcce   : > { %v2902_v61 = vsub.f32 %v2897_v57, %v2901_v60 }
 0xcd0   : > { %v2903_v62 = vmul.f32 %v2902_v61, %v2902_v61 }
 0xcd2   : > { %v2904_v63 = vsel %vm747_vm1, %v2903_v62, 0.0 }
 0xcd3   : > { %2905 = vadd.xlane.f32.xlu1 %v2904_v63 }
 0xd5c   : > { %v2906_v8 = vpop.xlane.xlu1 %2905 }
 0xd5d   : > { %v2907_v9 = vmul.f32 0.03125, %v2906_v8 }
 0xd5f   : > { %v2908_v10 = vadd.f32 1e-05, %v2907_v9 }
 0xd61   : > { %3873 = vrsqrt.f32 %v2908_v10 }
 0xd6e   : > { %v3874_v15 = vpop.eup %3873 }
 0xd6f   : > { %v2910_v16 = vmul.f32 %v3874_v15, %v2902_v61 }
 0xd71   : > { %v2915_v18 = vmul.f32 %v2914_v11, %v2910_v16 }
 0xd73   : > { %v2920_v19 = vadd.f32 %v2919_v17, %v2915_v18 }
 0xd75   : > { %3714 = vmatmul.mubr.msk.f32.vlgmr.msra.gmra.mxu1 %vm747_vm1, %v2920_v19 }
 0xe35   : > { %v3001_v5 = vpop.f32.mrf.mxu1 }
 0xe36   : > { %v3002_v22 = vadd.f32 %v3412_v21, %v3001_v5 }
 0xe37   : > { %v3715_v23 = vpop.f32.mrf.mxu1 }
 0xe38   : > { %v3005_v24 = vmax.f32 %v3002_v22, 0.0 }
 0xe3a   : > { %3733 = vmatmul.mubr.msk.f32.vlgmr.msra.gmra.mxu0 %vm3021_vm7, %v3005_v24 }
 0xefa   : > { %v3091_v25 = vpop.f32.mrf.mxu0 }
 0xefb   : > { %v3092_v26 = vadd.f32 %v3414_v0, %v3091_v25 }
 0xefc   : > { %v3734_v27 = vpop.f32.mrf.mxu0 }
 0xefd   : > { %v3095_v28 = vadd.f32 %v3092_v26, %v2920_v19 }
 0xeff   : > { %v3096_v29 = vsel %vm747_vm1, %v3095_v28, 0.0 }
 0xf00   : > { %3097 = vadd.xlane.f32.xlu0 %v3096_v29 }
 0xf89   : > { %v3098_v30 = vpop.xlane.xlu0 %3097 }
 0xf8a   : > { %v3099_v33 = vmul.f32 0.03125, %v3098_v30 }
 0xf8c   : > { %v3100_v34 = vsub.f32 %v3095_v28, %v3099_v33 }
 0xf8e   : > { %v3101_v35 = vmul.f32 %v3100_v34, %v3100_v34 }
 0xf90   : > { %v3102_v36 = vsel %vm747_vm1, %v3101_v35, 0.0 }
 0xf91   : > { %3103 = vadd.xlane.f32.xlu0 %v3102_v36 }
 0xf92   : > { %3998 = shalt.err (!%p3995_p2)
}
 0xf93   : > { %s3999_s25 = scalar_lea.hbm %s4769_s3, 512  ;;  %s4003_s15 = scalar_lea.hbm %s4901_s18, 1024 }
 0xf94   : > { %p4000_p6 = scmp.ne.s32.totalorder %s4769_s3, %s3999_s25  ;;  %p4004_p0 = scmp.lt.s32.totalorder %s4769_s3, %s4901_s18 }
 0xf95   : > { %p4005_p12 = scmp.lt.s32.totalorder %s4003_s15, %s3999_s25 }
 0xf96   : > { %p4001_p8 = pnand %p4000_p6, %p4302_p9 }
 0xf97   : > { %p4006_p3 = por %p4005_p12, %p4004_p0 }
 0xf98   : > { %p4002_p11 = pneg %p4001_p8 }
 0xf9a   : > { %p4007_p4 = pnand %p4006_p3, %p4002_p11 }
 0xf9c   : > { %4010 = shalt.err (!%p4007_p4)
}
 0xf9d   : > { %s4124_s30 = smov 128   ;;  %v3112_v43 = vrot.slane %v4538_v31, %v4462_v42  ;;  %v3117_v46 = vrot.slane %v4543_v32, %v4462_v42  ;;  %s3418_s0 = sshll.u32 %s4099_s24, 7 }
 0xf9e   : > { %3748 = dma.vmem_to_hbm [thread:$0]  (%p4302_p9), %s4771_s19, 512, %s4769_s3, %s3126_s7, %s4124_s30, %s4124_s30, %s4120_s21  }
 0xf9f   : > { %s677_s4 = scalar_lea.vmem [#allocation14], %s4347_s12  ;;  %s4902_s3 = sld [smem:[#allocation35_spill]] }
 0xfa0   : > { %s3140_s13 = sshll.u32 %s677_s4, 4  ;;  %s3121_s25 = scalar_lea.sflag [#allocation8], %s4344_s5  ;;  %s3141_s13 = int_to_ptr.vmem [resolvable:$true] %s3140_s13 }
 0xfa1   : > { %s4011_s27 = scalar_lea.vmem %s3141_s13, 128  ;;  %s4125_s16 = smov [#allocation14]  }
 0xfa2   : > { %p4012_p7 = scmp.ne.s32.totalorder %s3141_s13, %s4011_s27  ;;  %s4015_s15 = sshll.u32 %s4125_s16, 4  ;;  %s4016_s15 = int_to_ptr.vmem [resolvable:$false] %s4015_s15 }
 0xfa3   : > { %s4017_s24 = scalar_lea.vmem %s4016_s15, 256  ;;  %p4018_p10 = scmp.lt.s32.totalorder %s3141_s13, %s4016_s15 }
 0xfa4   : > { %p4013_p13 = pnand %p4012_p7, %p4302_p9  ;;  %p4019_p1 = scmp.lt.s32.totalorder %s4017_s24, %s4011_s27 }
 0xfa5   : > { %s3138_s7 = scalar_lea.hbm %s4902_s3, %s3418_s0 }
 0xfa6   : > { %p4014_p5 = pneg %p4013_p13  ;;  %p4020_p2 = por %p4019_p1, %p4018_p10 }
 0xfa8   : > { %p4021_p6 = pnand %p4020_p2, %p4014_p5 }
0x101a   : > { %v3104_v37 = vpop.xlane.xlu0 %3103 }
0x101b   : > { %v3105_v40 = vmul.f32 0.03125, %v3104_v37 }
0x101d   : > { %v3106_v41 = vadd.f32 1e-05, %v3105_v40 }
0x101f   : > { %3875 = vrsqrt.f32 %v3106_v41 }
0x102c   : > { %v3876_v44 = vpop.eup %3875 }
0x102d   : > { %v3108_v45 = vmul.f32 %v3876_v44, %v3100_v34 }
0x102f   : > { %v3113_v47 = vmul.f32 %v3112_v43, %v3108_v45 }
0x1031   : > { %v3118_v48 = vadd.f32 %v3117_v46, %v3113_v47 }
0x1033   : > { %3119 = vst.msk [vmem:[%s677_s4] sm:$0xff] %vm747_vm1, %v3118_v48 }
0x1034   : > { %4024 = shalt.err (!%p4021_p6)
}
0x1035   : > { %s4025_s12 = scalar_lea.hbm %s3138_s7, 128  ;;  %s4029_s29 = scalar_lea.hbm %s4902_s3, 256 }
0x1036   : > { %p4026_p8 = scmp.ne.s32.totalorder %s3138_s7, %s4025_s12  ;;  %p4030_p12 = scmp.lt.s32.totalorder %s3138_s7, %s4902_s3 }
0x1037   : > { %p4031_p3 = scmp.lt.s32.totalorder %s4029_s29, %s4025_s12 }
0x1038   : > { %p4027_p11 = pnand %p4026_p8, %p4302_p9 }
0x1039   : > { %p4032_p4 = por %p4031_p3, %p4030_p12 }
0x103a   : > { %p4028_p0 = pneg %p4027_p11 }
0x103c   : > { %p4033_p7 = pnand %p4032_p4, %p4028_p0 }
0x103e   : > { %4036 = shalt.err (!%p4033_p7)
}
0x103f   : > { %3747 = dma.vmem_to_hbm [thread:$0]  (%p4302_p9), %s3141_s13, 128, %s3138_s7, %s3121_s25  }
0x1040 PF: > { %s4903_s4 = sld [smem:[#allocation23_spill]]  ;;  %p4906_p5 = scmp.ge.s32.totalorder %s4107_s26, 2 }
0x1041   : > { %s4904_s21 = sld [smem:[#allocation25_spill]] }
0x1046   : > { %s3169_s19 = sand.u32 1, %s4903_s4  }
0x1047   : > { %p4905_p13 = scmp.ne.s32.totalorder %s4904_s21, 0  ;;  %s3170_s27 = scalar_lea.sflag [#allocation8], %s3169_s19 }
0x1049   : > { %p3766_p10 = pnand %p4906_p5, %p4905_p13 }
0x104b   : > { %p3767_p1 = pneg %p3766_p10 }
0x104d   : > { %4078 = dma.done.wait (%p3767_p1), %s3170_s27, 128  }
0x104e   : > { %4080 = vsyncadd (%p3767_p1), %s3170_s27, 4294967168  ;;  %s3179_s16 = scalar_lea.sflag [#allocation16], %s3169_s19 }
0x104f   : > { %4082 = dma.done.wait (%p3767_p1), %s3179_s16, 512  }
0x1050   : > { %4084 = vsyncadd (%p3767_p1), %s3179_s16, 4294966784  ;;  %s40_s26 = sadd.s32 1, %s4107_s26   ;;  %s4907_s24 = sld [smem:[#allocation24_spill]] }
0x1051   : > { %p37_p2 = scmp.ge.s32.totalorder %s40_s26, 4   ;;  %s4908_s25 = sld [smem:[#allocation26_spill]] }
0x1052   : > { %s4909_s21 = smov %s4091_s22  ;;  %s4910_s22 = smov %s4095_s23 }
0x1053   : > { %s4911_s23 = smov %s4311_s17  ;;  %39 = sbr.rel (!%p37_p2) target bundleno = 22 (0x16), region = 181 }
0x1058   :  { %3184 = vsyncpa [#allocation7], 1 }
0x1059   :  { %3186 = vsyncpa [#allocation7 + $0x1], 1 }
0x105a   :  { %3187 = vsyncpa [#allocation10], 1 }
0x105b   :  { %3189 = vsyncpa [#allocation10 + $0x1], 1 }
0x105c   :  { %3190 = vsyncpa [#allocation13], 1 }
0x105d   :  { %3191 = vsyncpa [#allocation8], 1 }
0x105e   :  { %3193 = vsyncpa [#allocation8 + $0x1], 1 }
0x105f   :  { %3194 = vsyncpa [#allocation16], 1 }
0x1060   :  { %3196 = vsyncpa [#allocation16 + $0x1], 1 }

</bundles_post_ra>
